<compile_context>
chip_gen: v7x
topology: tpu7x:2x2x1
jax: 0.10.0
libtpu: 0.0.40
codegen_flags: <defaults>
</compile_context>

<pallas_src>
import functools
import math

import jax
import jax.numpy as jnp
from jax.experimental import pallas as pl
from jax.experimental.pallas import tpu as pltpu

LN_EPS = 1e-12  # BERT LayerNorm eps


def _gelu_exact(x):
    # HF BERT default hidden_act="gelu" (exact erf form).
    return 0.5 * x * (1.0 + jax.lax.erf(x * (1.0 / math.sqrt(2.0))))


def _layernorm(x, gamma, beta):
    mu = jnp.mean(x, axis=-1, keepdims=True)
    var = jnp.mean((x - mu) ** 2, axis=-1, keepdims=True)
    inv = jax.lax.rsqrt(var + LN_EPS)
    return (x - mu) * inv * gamma + beta


def _pick_tile(n, target, align):
    """Largest divisor of n that is <= target and a multiple of `align`;
    falls back to the full extent n if no such divisor exists."""
    if n <= target:
        return n
    for t in range(target, align - 1, -1):
        if n % t == 0 and t % align == 0:
            return t
    return n


def bert_layer_kernel(h_ref, mask_ref,
                      wq_ref, bq_ref, wk_ref, bk_ref, wv_ref, bv_ref,
                      wo_ref, bo_ref, ln1_g_ref, ln1_b_ref,
                      wi_ref, bi_ref, w2_ref, b2_ref, ln2_g_ref, ln2_b_ref,
                      out_ref, *, num_heads, ffn_chunks):
    f32, bf16 = jnp.float32, jnp.bfloat16
    TQ, H = out_ref.shape          # query tile
    S = h_ref.shape[0]             # full sequence (per batch element)
    dH = H // num_heads
    scale = 1.0 / math.sqrt(dH)

    # Query tile sliced from the resident full-sequence block.
    q_start = pl.multiple_of(pl.program_id(1) * TQ, TQ)
    h_res = h_ref[pl.ds(q_start, TQ), :].astype(f32)   # (TQ, H) f32 residual copy
    hq = h_res.astype(bf16)
    hkv = h_ref[...].astype(bf16)                      # (S, H)

    # QKV projections: wide (N = H) MXU matmuls, bf16 operands / f32 accumulate.
    q = jnp.dot(hq, wq_ref[...], preferred_element_type=f32) + bq_ref[...]
    q = (q * scale).astype(bf16)          # fold 1/sqrt(dH) into q once
    k = (jnp.dot(hkv, wk_ref[...], preferred_element_type=f32)
         + bk_ref[...]).astype(bf16)
    v = (jnp.dot(hkv, wv_ref[...], preferred_element_type=f32)
         + bv_ref[...]).astype(bf16)

    # Additive mask, broadcast ONCE (JAX does not CSE broadcast_in_dim).
    mask_tile = jnp.broadcast_to(mask_ref[...].astype(f32), (TQ, S))

    # Per-head attention (K=dH is inherent); contexts are restacked so the
    # output projection is a single K=H matmul instead of num_heads K=dH ones.
    ctx_heads = []
    for hd in range(num_heads):
        sl = slice(hd * dH, (hd + 1) * dH)
        qh, kh, vh = q[:, sl], k[:, sl], v[:, sl]
        s = jnp.einsum('qd,kd->qk', qh, kh, preferred_element_type=f32)
        s = s + mask_tile
        s = s - jnp.max(s, axis=-1, keepdims=True)
        p = jnp.exp(s)
        p = p * pl.reciprocal(jnp.sum(p, axis=-1, keepdims=True), approx=True)
        ctx_heads.append(jnp.dot(p.astype(bf16), vh,
                                 preferred_element_type=f32))   # (TQ, dH)
    ctx = jnp.concatenate(ctx_heads, axis=-1).astype(bf16)      # (TQ, H)

    attn = jnp.dot(ctx, wo_ref[...], preferred_element_type=f32) + bo_ref[...]

    # Residual + LayerNorm (dropout is identity in eval mode), f32.
    h1 = _layernorm(attn + h_res, ln1_g_ref[...], ln1_b_ref[...])
    h1_bf = h1.astype(bf16)

    # FFN chunked over the intermediate dim: the (TQ, I) activation never
    # materializes; f32 accumulator carried through the loop.
    def ffn_body(c, acc):
        inter = jnp.dot(h1_bf, wi_ref[c], preferred_element_type=f32) + bi_ref[c]
        inter = _gelu_exact(inter)
        return acc + jnp.dot(inter.astype(bf16), w2_ref[c],
                             preferred_element_type=f32)

    ffn = jax.lax.fori_loop(0, ffn_chunks, ffn_body,
                            jnp.zeros((TQ, H), f32)) + b2_ref[...]

    out_ref[...] = _layernorm(ffn + h1, ln2_g_ref[...],
                              ln2_b_ref[...]).astype(out_ref.dtype)


def bert_layer(h, mask_3d, p, num_heads, *, q_tile=256, ffn_chunk=512):
    B, S, H = h.shape
    I = p['wi'].shape[1]
    assert H % num_heads == 0

    TQ = _pick_tile(S, q_tile, 8)       # query tile (sublane-aligned or full S)
    C = _pick_tile(I, ffn_chunk, 128)   # FFN chunk (lane-aligned or full I)
    nC = I // C

    f32, bf16 = jnp.float32, jnp.bfloat16
    # bf16 weight matrices (halves VMEM, ~2x MXU throughput); biases/LN in f32.
    wq = p['wq'].astype(bf16)
    wk = p['wk'].astype(bf16)
    wv = p['wv'].astype(bf16)
    wo = p['wo'].astype(bf16)
    wi = p['wi'].astype(bf16).reshape(H, nC, C).transpose(1, 0, 2)  # (nC, H, C)
    w2 = p['w2'].astype(bf16).reshape(nC, C, H)                     # (nC, C, H)
    bq = p['bq'].astype(f32).reshape(1, H)
    bk = p['bk'].astype(f32).reshape(1, H)
    bv = p['bv'].astype(f32).reshape(1, H)
    bo = p['bo'].astype(f32).reshape(1, H)
    bi = p['bi'].astype(f32).reshape(nC, 1, C)
    b2 = p['b2'].astype(f32).reshape(1, H)
    ln1_g = p['ln1_g'].astype(f32).reshape(1, H)
    ln1_b = p['ln1_b'].astype(f32).reshape(1, H)
    ln2_g = p['ln2_g'].astype(f32).reshape(1, H)
    ln2_b = p['ln2_b'].astype(f32).reshape(1, H)

    params = (wq, bq, wk, bk, wv, bv, wo, bo, ln1_g, ln1_b,
              wi, bi, w2, b2, ln2_g, ln2_b)

    def _const_spec(x):
        zeros = (0,) * x.ndim
        return pl.BlockSpec(x.shape, lambda b, q: zeros)   # VMEM-resident

    in_specs = [
        # Full-sequence block per batch element (resident across the q axis);
        # both the q-tile and K/V are taken from it inside the kernel.
        pl.BlockSpec((None, S, H), lambda b, q: (b, 0, 0)),
        # Additive mask row (B, 1, S).
        pl.BlockSpec((None, 1, S), lambda b, q: (b, 0, 0)),
    ] + [_const_spec(x) for x in params]

    out_spec = pl.BlockSpec((None, TQ, H), lambda b, q: (b, q, 0))

    # VMEM budget from tile arithmetic: double-buffered in/out blocks +
    # resident weights (counted x2, conservative) + in-kernel temporaries.
    tiles = 2 * (S * H * 4 + S * 4 + TQ * H * 4)
    weights = 2 * ((4 * H * H + 2 * H * I) * 2 + (9 * H + I) * 4)
    temps = (3 * S * H + 8 * TQ * H + 4 * TQ * S + 2 * TQ * C) * 4
    vmem_limit = int(max(32 << 20, min(tiles + weights + temps + (4 << 20),
                                       112 << 20)))

    kernel = functools.partial(bert_layer_kernel, num_heads=num_heads,
                               ffn_chunks=nC)
    return pl.pallas_call(
        kernel,
        grid=(B, S // TQ),
        in_specs=in_specs,
        out_specs=out_spec,
        out_shape=jax.ShapeDtypeStruct(h.shape, h.dtype),
        compiler_params=pltpu.CompilerParams(
            dimension_semantics=("parallel", "parallel"),
            vmem_limit_bytes=vmem_limit),
    )(h, mask_3d, *params)


def bert_encoder_forward(n_cycles_pack, hidden_states, attention_mask,
                         layer_params, num_heads):
    # N_cycles arrives packed as (N_cycles, writer, global_step), per reference.
    n_cycles, _writer, _global_step = n_cycles_pack
    mask_3d = attention_mask[:, 0]          # glue: (B,1,1,S) -> (B,1,S)
    h = hidden_states
    num_layers = len(layer_params)
    for i, p in enumerate(layer_params):
        if i == num_layers - 1:
            # Eval-mode last-layer "cycling": the PyTorch inner loop calls the
            # layer N_cycles times on the SAME (un-updated) hidden_states and
            # keeps the last output, which equals one application for
            # N_cycles >= 1 -- reproduced exactly.
            assert n_cycles >= 1
            h = bert_layer(h, mask_3d, p, num_heads)
        else:
            h = bert_layer(h, mask_3d, p, num_heads)
    return h


def init_layer_params(key, hidden, intermediate):
    ks = jax.random.split(key, 6)
    std = 0.02

    def w(k, i, o):
        return jax.random.normal(k, (i, o), jnp.float32) * std

    return dict(
        wq=w(ks[0], hidden, hidden), bq=jnp.zeros((hidden,), jnp.float32),
        wk=w(ks[1], hidden, hidden), bk=jnp.zeros((hidden,), jnp.float32),
        wv=w(ks[2], hidden, hidden), bv=jnp.zeros((hidden,), jnp.float32),
        wo=w(ks[3], hidden, hidden), bo=jnp.zeros((hidden,), jnp.float32),
        ln1_g=jnp.ones((hidden,), jnp.float32),
        ln1_b=jnp.zeros((hidden,), jnp.float32),
        wi=w(ks[4], hidden, intermediate),
        bi=jnp.zeros((intermediate,), jnp.float32),
        w2=w(ks[5], intermediate, hidden),
        b2=jnp.zeros((hidden,), jnp.float32),
        ln2_g=jnp.ones((hidden,), jnp.float32),
        ln2_b=jnp.zeros((hidden,), jnp.float32),
    )


if __name__ == "__main__":
    # Small config: num_hidden_layers=2, hidden=32, heads=4, intermediate=64.
    B, S, H, NH, INTER, L = 2, 8, 32, 4, 64, 2
    key = jax.random.PRNGKey(0)
    k_h, k_layers = jax.random.split(key)

    hidden_states = jax.random.normal(k_h, (B, S, H), jnp.float32)

    # HF-style extended additive attention mask (B, 1, 1, S): batch 0 attends
    # to all 8 positions, batch 1 only to the first 6.
    lengths = jnp.array([8, 6], jnp.int32)
    keep = (jnp.arange(S)[None, :] < lengths[:, None]).astype(jnp.float32)
    attention_mask = ((1.0 - keep) * -10000.0)[:, None, None, :]

    layer_params = [init_layer_params(k, H, INTER)
                    for k in jax.random.split(k_layers, L)]

    n_cycles_pack = (3, None, 0)   # (N_cycles, writer, global_step)
    out = bert_encoder_forward(n_cycles_pack, hidden_states, attention_mask,
                               layer_params, NH)
    out = jax.block_until_ready(out)
    assert out.shape == (B, S, H) and out.dtype == jnp.float32
    assert bool(jnp.all(jnp.isfinite(out)))
    print("KERNEL_OK")
</pallas_src>

<mosaic_0001>
module attributes {stable_mosaic.version = 11 : i64} {
  func.func @bert_layer_kernel(%arg0: i32, %arg1: i32, %arg2: memref<1x8x32xf32, #tpu.memory_space<vmem>>, %arg3: memref<1x1x8xf32, #tpu.memory_space<vmem>>, %arg4: memref<32x32xbf16, #tpu.memory_space<vmem>>, %arg5: memref<1x32xf32, #tpu.memory_space<vmem>>, %arg6: memref<32x32xbf16, #tpu.memory_space<vmem>>, %arg7: memref<1x32xf32, #tpu.memory_space<vmem>>, %arg8: memref<32x32xbf16, #tpu.memory_space<vmem>>, %arg9: memref<1x32xf32, #tpu.memory_space<vmem>>, %arg10: memref<32x32xbf16, #tpu.memory_space<vmem>>, %arg11: memref<1x32xf32, #tpu.memory_space<vmem>>, %arg12: memref<1x32xf32, #tpu.memory_space<vmem>>, %arg13: memref<1x32xf32, #tpu.memory_space<vmem>>, %arg14: memref<1x32x64xbf16, #tpu.memory_space<vmem>>, %arg15: memref<1x1x64xf32, #tpu.memory_space<vmem>>, %arg16: memref<1x64x32xbf16, #tpu.memory_space<vmem>>, %arg17: memref<1x32xf32, #tpu.memory_space<vmem>>, %arg18: memref<1x32xf32, #tpu.memory_space<vmem>>, %arg19: memref<1x32xf32, #tpu.memory_space<vmem>>, %arg20: memref<1x8x32xf32, #tpu.memory_space<vmem>>) attributes {dimension_semantics = [#tpu.dimension_semantics<parallel>, #tpu.dimension_semantics<parallel>], iteration_bounds = array<i64: 2, 1>, scalar_prefetch = 0 : i64, scratch_operands = 0 : i64, tpu.core_type = #tpu.core_type<tc>, window_params = [{transform_indices = @transform_0, window_bounds = array<i64: 1, 8, 32>}, {transform_indices = @transform_1, window_bounds = array<i64: 1, 1, 8>}, {pipeline_mode = #tpu.pipeline_mode<synchronous>, transform_indices = @transform_2, window_bounds = array<i64: 32, 32>}, {pipeline_mode = #tpu.pipeline_mode<synchronous>, transform_indices = @transform_3, window_bounds = array<i64: 1, 32>}, {pipeline_mode = #tpu.pipeline_mode<synchronous>, transform_indices = @transform_4, window_bounds = array<i64: 32, 32>}, {pipeline_mode = #tpu.pipeline_mode<synchronous>, transform_indices = @transform_5, window_bounds = array<i64: 1, 32>}, {pipeline_mode = #tpu.pipeline_mode<synchronous>, transform_indices = @transform_6, window_bounds = array<i64: 32, 32>}, {pipeline_mode = #tpu.pipeline_mode<synchronous>, transform_indices = @transform_7, window_bounds = array<i64: 1, 32>}, {pipeline_mode = #tpu.pipeline_mode<synchronous>, transform_indices = @transform_8, window_bounds = array<i64: 32, 32>}, {pipeline_mode = #tpu.pipeline_mode<synchronous>, transform_indices = @transform_9, window_bounds = array<i64: 1, 32>}, {pipeline_mode = #tpu.pipeline_mode<synchronous>, transform_indices = @transform_10, window_bounds = array<i64: 1, 32>}, {pipeline_mode = #tpu.pipeline_mode<synchronous>, transform_indices = @transform_11, window_bounds = array<i64: 1, 32>}, {pipeline_mode = #tpu.pipeline_mode<synchronous>, transform_indices = @transform_12, window_bounds = array<i64: 1, 32, 64>}, {pipeline_mode = #tpu.pipeline_mode<synchronous>, transform_indices = @transform_13, window_bounds = array<i64: 1, 1, 64>}, {pipeline_mode = #tpu.pipeline_mode<synchronous>, transform_indices = @transform_14, window_bounds = array<i64: 1, 64, 32>}, {pipeline_mode = #tpu.pipeline_mode<synchronous>, transform_indices = @transform_15, window_bounds = array<i64: 1, 32>}, {pipeline_mode = #tpu.pipeline_mode<synchronous>, transform_indices = @transform_16, window_bounds = array<i64: 1, 32>}, {pipeline_mode = #tpu.pipeline_mode<synchronous>, transform_indices = @transform_17, window_bounds = array<i64: 1, 32>}, {transform_indices = @transform_18, window_bounds = array<i64: 1, 8, 32>}]} {
    %c8_i32 = arith.constant 8 : i32
    %0 = arith.muli %arg1, %c8_i32 : i32
    %1 = tpu.assume_multiple %0, 8 : i32
    %c0 = arith.constant 0 : index
    %2 = arith.index_cast %1 : i32 to index
    %c0_0 = arith.constant 0 : index
    %3 = vector.load %arg2[%c0, %2, %c0_0] : memref<1x8x32xf32, #tpu.memory_space<vmem>>, vector<1x8x32xf32>
    %4 = vector.shape_cast %3 : vector<1x8x32xf32> to vector<8x32xf32>
    %5 = arith.truncf %4 : vector<8x32xf32> to vector<8x32xbf16>
    %c0_1 = arith.constant 0 : index
    %c0_2 = arith.constant 0 : index
    %c0_3 = arith.constant 0 : index
    %6 = vector.load %arg2[%c0_1, %c0_2, %c0_3] : memref<1x8x32xf32, #tpu.memory_space<vmem>>, vector<1x8x32xf32>
    %7 = vector.shape_cast %6 : vector<1x8x32xf32> to vector<8x32xf32>
    %8 = arith.truncf %7 : vector<8x32xf32> to vector<8x32xbf16>
    %c0_4 = arith.constant 0 : index
    %c0_5 = arith.constant 0 : index
    %9 = vector.load %arg4[%c0_4, %c0_5] : memref<32x32xbf16, #tpu.memory_space<vmem>>, vector<32x32xbf16>
    %cst = arith.constant dense<0.000000e+00> : vector<8x32xf32>
    %10 = tpu.matmul %5, %9, %cst {dimension_numbers = #tpu.dot_dimension_numbers<[1], [0], [0], [1], [0, 0, 1, 1], [], []>} : vector<8x32xbf16>, vector<32x32xbf16>, vector<8x32xf32> -> vector<8x32xf32>
    %c0_6 = arith.constant 0 : index
    %c0_7 = arith.constant 0 : index
    %11 = vector.load %arg5[%c0_6, %c0_7] : memref<1x32xf32, #tpu.memory_space<vmem>>, vector<1x32xf32>
    %12 = vector.broadcast %11 : vector<1x32xf32> to vector<8x32xf32>
    %13 = arith.addf %10, %12 : vector<8x32xf32>
    %cst_8 = arith.constant 0.353553385 : f32
    %14 = vector.broadcast %cst_8 : f32 to vector<8x32xf32>
    %15 = arith.mulf %13, %14 : vector<8x32xf32>
    %16 = arith.truncf %15 : vector<8x32xf32> to vector<8x32xbf16>
    %c0_9 = arith.constant 0 : index
    %c0_10 = arith.constant 0 : index
    %17 = vector.load %arg6[%c0_9, %c0_10] : memref<32x32xbf16, #tpu.memory_space<vmem>>, vector<32x32xbf16>
    %cst_11 = arith.constant dense<0.000000e+00> : vector<8x32xf32>
    %18 = tpu.matmul %8, %17, %cst_11 {dimension_numbers = #tpu.dot_dimension_numbers<[1], [0], [0], [1], [0, 0, 1, 1], [], []>} : vector<8x32xbf16>, vector<32x32xbf16>, vector<8x32xf32> -> vector<8x32xf32>
    %c0_12 = arith.constant 0 : index
    %c0_13 = arith.constant 0 : index
    %19 = vector.load %arg7[%c0_12, %c0_13] : memref<1x32xf32, #tpu.memory_space<vmem>>, vector<1x32xf32>
    %20 = vector.broadcast %19 : vector<1x32xf32> to vector<8x32xf32>
    %21 = arith.addf %18, %20 : vector<8x32xf32>
    %22 = arith.truncf %21 : vector<8x32xf32> to vector<8x32xbf16>
    %c0_14 = arith.constant 0 : index
    %c0_15 = arith.constant 0 : index
    %23 = vector.load %arg8[%c0_14, %c0_15] : memref<32x32xbf16, #tpu.memory_space<vmem>>, vector<32x32xbf16>
    %cst_16 = arith.constant dense<0.000000e+00> : vector<8x32xf32>
    %24 = tpu.matmul %8, %23, %cst_16 {dimension_numbers = #tpu.dot_dimension_numbers<[1], [0], [0], [1], [0, 0, 1, 1], [], []>} : vector<8x32xbf16>, vector<32x32xbf16>, vector<8x32xf32> -> vector<8x32xf32>
    %c0_17 = arith.constant 0 : index
    %c0_18 = arith.constant 0 : index
    %25 = vector.load %arg9[%c0_17, %c0_18] : memref<1x32xf32, #tpu.memory_space<vmem>>, vector<1x32xf32>
    %26 = vector.broadcast %25 : vector<1x32xf32> to vector<8x32xf32>
    %27 = arith.addf %24, %26 : vector<8x32xf32>
    %28 = arith.truncf %27 : vector<8x32xf32> to vector<8x32xbf16>
    %c0_19 = arith.constant 0 : index
    %c0_20 = arith.constant 0 : index
    %c0_21 = arith.constant 0 : index
    %29 = vector.load %arg3[%c0_19, %c0_20, %c0_21] : memref<1x1x8xf32, #tpu.memory_space<vmem>>, vector<1x1x8xf32>
    %30 = vector.shape_cast %29 : vector<1x1x8xf32> to vector<1x8xf32>
    %31 = vector.shape_cast %30 : vector<1x8xf32> to vector<1x8xf32>
    %32 = vector.broadcast %31 : vector<1x8xf32> to vector<8x8xf32>
    %33 = vector.extract_strided_slice %16 {offsets = [0, 0], sizes = [8, 8], strides = [1, 1]} : vector<8x32xbf16> to vector<8x8xbf16>
    %34 = vector.extract_strided_slice %22 {offsets = [0, 0], sizes = [8, 8], strides = [1, 1]} : vector<8x32xbf16> to vector<8x8xbf16>
    %35 = vector.extract_strided_slice %28 {offsets = [0, 0], sizes = [8, 8], strides = [1, 1]} : vector<8x32xbf16> to vector<8x8xbf16>
    "tpu.trace_start"() <{level = 10 : i32, message = "qd,kd->qk"}> : () -> ()
    %cst_22 = arith.constant dense<0.000000e+00> : vector<8x8xf32>
    %36 = tpu.matmul %33, %34, %cst_22 {dimension_numbers = #tpu.dot_dimension_numbers<[1], [1], [0], [0], [0, 0, 1, 0], [], []>} : vector<8x8xbf16>, vector<8x8xbf16>, vector<8x8xf32> -> vector<8x8xf32>
    "tpu.trace_stop"() : () -> ()
    %37 = arith.addf %36, %32 : vector<8x8xf32>
    %cst_23 = arith.constant dense<0xFF800000> : vector<8xf32>
    %38 = vector.multi_reduction <maximumf>, %37, %cst_23 [1] : vector<8x8xf32> to vector<8xf32>
    %39 = vector.shape_cast %38 : vector<8xf32> to vector<8x1xf32>
    %40 = vector.broadcast %39 : vector<8x1xf32> to vector<8x8xf32>
    %41 = arith.subf %37, %40 : vector<8x8xf32>
    %42 = math.exp %41 : vector<8x8xf32>
    %cst_24 = arith.constant dense<0.000000e+00> : vector<8xf32>
    %43 = vector.multi_reduction <add>, %42, %cst_24 [1] : vector<8x8xf32> to vector<8xf32>
    %44 = vector.shape_cast %43 : vector<8xf32> to vector<8x1xf32>
    %45 = tpu.reciprocal %44 {approx = true} : vector<8x1xf32> -> vector<8x1xf32>
    %46 = vector.broadcast %45 : vector<8x1xf32> to vector<8x8xf32>
    %47 = arith.mulf %42, %46 : vector<8x8xf32>
    %48 = arith.truncf %47 : vector<8x8xf32> to vector<8x8xbf16>
    %cst_25 = arith.constant dense<0.000000e+00> : vector<8x8xf32>
    %49 = tpu.matmul %48, %35, %cst_25 {dimension_numbers = #tpu.dot_dimension_numbers<[1], [0], [0], [1], [0, 0, 1, 1], [], []>} : vector<8x8xbf16>, vector<8x8xbf16>, vector<8x8xf32> -> vector<8x8xf32>
    %50 = vector.extract_strided_slice %16 {offsets = [0, 8], sizes = [8, 8], strides = [1, 1]} : vector<8x32xbf16> to vector<8x8xbf16>
    %51 = vector.extract_strided_slice %22 {offsets = [0, 8], sizes = [8, 8], strides = [1, 1]} : vector<8x32xbf16> to vector<8x8xbf16>
    %52 = vector.extract_strided_slice %28 {offsets = [0, 8], sizes = [8, 8], strides = [1, 1]} : vector<8x32xbf16> to vector<8x8xbf16>
    "tpu.trace_start"() <{level = 10 : i32, message = "qd,kd->qk"}> : () -> ()
    %cst_26 = arith.constant dense<0.000000e+00> : vector<8x8xf32>
    %53 = tpu.matmul %50, %51, %cst_26 {dimension_numbers = #tpu.dot_dimension_numbers<[1], [1], [0], [0], [0, 0, 1, 0], [], []>} : vector<8x8xbf16>, vector<8x8xbf16>, vector<8x8xf32> -> vector<8x8xf32>
    "tpu.trace_stop"() : () -> ()
    %54 = arith.addf %53, %32 : vector<8x8xf32>
    %cst_27 = arith.constant dense<0xFF800000> : vector<8xf32>
    %55 = vector.multi_reduction <maximumf>, %54, %cst_27 [1] : vector<8x8xf32> to vector<8xf32>
    %56 = vector.shape_cast %55 : vector<8xf32> to vector<8x1xf32>
    %57 = vector.broadcast %56 : vector<8x1xf32> to vector<8x8xf32>
    %58 = arith.subf %54, %57 : vector<8x8xf32>
    %59 = math.exp %58 : vector<8x8xf32>
    %cst_28 = arith.constant dense<0.000000e+00> : vector<8xf32>
    %60 = vector.multi_reduction <add>, %59, %cst_28 [1] : vector<8x8xf32> to vector<8xf32>
    %61 = vector.shape_cast %60 : vector<8xf32> to vector<8x1xf32>
    %62 = tpu.reciprocal %61 {approx = true} : vector<8x1xf32> -> vector<8x1xf32>
    %63 = vector.broadcast %62 : vector<8x1xf32> to vector<8x8xf32>
    %64 = arith.mulf %59, %63 : vector<8x8xf32>
    %65 = arith.truncf %64 : vector<8x8xf32> to vector<8x8xbf16>
    %cst_29 = arith.constant dense<0.000000e+00> : vector<8x8xf32>
    %66 = tpu.matmul %65, %52, %cst_29 {dimension_numbers = #tpu.dot_dimension_numbers<[1], [0], [0], [1], [0, 0, 1, 1], [], []>} : vector<8x8xbf16>, vector<8x8xbf16>, vector<8x8xf32> -> vector<8x8xf32>
    %67 = vector.extract_strided_slice %16 {offsets = [0, 16], sizes = [8, 8], strides = [1, 1]} : vector<8x32xbf16> to vector<8x8xbf16>
    %68 = vector.extract_strided_slice %22 {offsets = [0, 16], sizes = [8, 8], strides = [1, 1]} : vector<8x32xbf16> to vector<8x8xbf16>
    %69 = vector.extract_strided_slice %28 {offsets = [0, 16], sizes = [8, 8], strides = [1, 1]} : vector<8x32xbf16> to vector<8x8xbf16>
    "tpu.trace_start"() <{level = 10 : i32, message = "qd,kd->qk"}> : () -> ()
    %cst_30 = arith.constant dense<0.000000e+00> : vector<8x8xf32>
    %70 = tpu.matmul %67, %68, %cst_30 {dimension_numbers = #tpu.dot_dimension_numbers<[1], [1], [0], [0], [0, 0, 1, 0], [], []>} : vector<8x8xbf16>, vector<8x8xbf16>, vector<8x8xf32> -> vector<8x8xf32>
    "tpu.trace_stop"() : () -> ()
    %71 = arith.addf %70, %32 : vector<8x8xf32>
    %cst_31 = arith.constant dense<0xFF800000> : vector<8xf32>
    %72 = vector.multi_reduction <maximumf>, %71, %cst_31 [1] : vector<8x8xf32> to vector<8xf32>
    %73 = vector.shape_cast %72 : vector<8xf32> to vector<8x1xf32>
    %74 = vector.broadcast %73 : vector<8x1xf32> to vector<8x8xf32>
    %75 = arith.subf %71, %74 : vector<8x8xf32>
    %76 = math.exp %75 : vector<8x8xf32>
    %cst_32 = arith.constant dense<0.000000e+00> : vector<8xf32>
    %77 = vector.multi_reduction <add>, %76, %cst_32 [1] : vector<8x8xf32> to vector<8xf32>
    %78 = vector.shape_cast %77 : vector<8xf32> to vector<8x1xf32>
    %79 = tpu.reciprocal %78 {approx = true} : vector<8x1xf32> -> vector<8x1xf32>
    %80 = vector.broadcast %79 : vector<8x1xf32> to vector<8x8xf32>
    %81 = arith.mulf %76, %80 : vector<8x8xf32>
    %82 = arith.truncf %81 : vector<8x8xf32> to vector<8x8xbf16>
    %cst_33 = arith.constant dense<0.000000e+00> : vector<8x8xf32>
    %83 = tpu.matmul %82, %69, %cst_33 {dimension_numbers = #tpu.dot_dimension_numbers<[1], [0], [0], [1], [0, 0, 1, 1], [], []>} : vector<8x8xbf16>, vector<8x8xbf16>, vector<8x8xf32> -> vector<8x8xf32>
    %84 = vector.extract_strided_slice %16 {offsets = [0, 24], sizes = [8, 8], strides = [1, 1]} : vector<8x32xbf16> to vector<8x8xbf16>
    %85 = vector.extract_strided_slice %22 {offsets = [0, 24], sizes = [8, 8], strides = [1, 1]} : vector<8x32xbf16> to vector<8x8xbf16>
    %86 = vector.extract_strided_slice %28 {offsets = [0, 24], sizes = [8, 8], strides = [1, 1]} : vector<8x32xbf16> to vector<8x8xbf16>
    "tpu.trace_start"() <{level = 10 : i32, message = "qd,kd->qk"}> : () -> ()
    %cst_34 = arith.constant dense<0.000000e+00> : vector<8x8xf32>
    %87 = tpu.matmul %84, %85, %cst_34 {dimension_numbers = #tpu.dot_dimension_numbers<[1], [1], [0], [0], [0, 0, 1, 0], [], []>} : vector<8x8xbf16>, vector<8x8xbf16>, vector<8x8xf32> -> vector<8x8xf32>
    "tpu.trace_stop"() : () -> ()
    %88 = arith.addf %87, %32 : vector<8x8xf32>
    %cst_35 = arith.constant dense<0xFF800000> : vector<8xf32>
    %89 = vector.multi_reduction <maximumf>, %88, %cst_35 [1] : vector<8x8xf32> to vector<8xf32>
    %90 = vector.shape_cast %89 : vector<8xf32> to vector<8x1xf32>
    %91 = vector.broadcast %90 : vector<8x1xf32> to vector<8x8xf32>
    %92 = arith.subf %88, %91 : vector<8x8xf32>
    %93 = math.exp %92 : vector<8x8xf32>
    %cst_36 = arith.constant dense<0.000000e+00> : vector<8xf32>
    %94 = vector.multi_reduction <add>, %93, %cst_36 [1] : vector<8x8xf32> to vector<8xf32>
    %95 = vector.shape_cast %94 : vector<8xf32> to vector<8x1xf32>
    %96 = tpu.reciprocal %95 {approx = true} : vector<8x1xf32> -> vector<8x1xf32>
    %97 = vector.broadcast %96 : vector<8x1xf32> to vector<8x8xf32>
    %98 = arith.mulf %93, %97 : vector<8x8xf32>
    %99 = arith.truncf %98 : vector<8x8xf32> to vector<8x8xbf16>
    %cst_37 = arith.constant dense<0.000000e+00> : vector<8x8xf32>
    %100 = tpu.matmul %99, %86, %cst_37 {dimension_numbers = #tpu.dot_dimension_numbers<[1], [0], [0], [1], [0, 0, 1, 1], [], []>} : vector<8x8xbf16>, vector<8x8xbf16>, vector<8x8xf32> -> vector<8x8xf32>
    %101 = tpu.concatenate %49, %66, %83, %100 in 1 : vector<8x8xf32>, vector<8x8xf32>, vector<8x8xf32>, vector<8x8xf32> -> vector<8x32xf32>
    %102 = arith.truncf %101 : vector<8x32xf32> to vector<8x32xbf16>
    %c0_38 = arith.constant 0 : index
    %c0_39 = arith.constant 0 : index
    %103 = vector.load %arg10[%c0_38, %c0_39] : memref<32x32xbf16, #tpu.memory_space<vmem>>, vector<32x32xbf16>
    %cst_40 = arith.constant dense<0.000000e+00> : vector<8x32xf32>
    %104 = tpu.matmul %102, %103, %cst_40 {dimension_numbers = #tpu.dot_dimension_numbers<[1], [0], [0], [1], [0, 0, 1, 1], [], []>} : vector<8x32xbf16>, vector<32x32xbf16>, vector<8x32xf32> -> vector<8x32xf32>
    %c0_41 = arith.constant 0 : index
    %c0_42 = arith.constant 0 : index
    %105 = vector.load %arg11[%c0_41, %c0_42] : memref<1x32xf32, #tpu.memory_space<vmem>>, vector<1x32xf32>
    %106 = vector.broadcast %105 : vector<1x32xf32> to vector<8x32xf32>
    %107 = arith.addf %104, %106 : vector<8x32xf32>
    %108 = arith.addf %107, %4 : vector<8x32xf32>
    %c0_43 = arith.constant 0 : index
    %c0_44 = arith.constant 0 : index
    %109 = vector.load %arg12[%c0_43, %c0_44] : memref<1x32xf32, #tpu.memory_space<vmem>>, vector<1x32xf32>
    %c0_45 = arith.constant 0 : index
    %c0_46 = arith.constant 0 : index
    %110 = vector.load %arg13[%c0_45, %c0_46] : memref<1x32xf32, #tpu.memory_space<vmem>>, vector<1x32xf32>
    %cst_47 = arith.constant dense<0.000000e+00> : vector<8xf32>
    %111 = vector.multi_reduction <add>, %108, %cst_47 [1] : vector<8x32xf32> to vector<8xf32>
    %112 = vector.shape_cast %111 : vector<8xf32> to vector<8x1xf32>
    %cst_48 = arith.constant 3.200000e+01 : f32
    %113 = vector.broadcast %cst_48 : f32 to vector<8x1xf32>
    %114 = arith.divf %112, %113 : vector<8x1xf32>
    %115 = vector.broadcast %114 : vector<8x1xf32> to vector<8x32xf32>
    %116 = arith.subf %108, %115 : vector<8x32xf32>
    %117 = arith.mulf %116, %116 : vector<8x32xf32>
    %cst_49 = arith.constant dense<0.000000e+00> : vector<8xf32>
    %118 = vector.multi_reduction <add>, %117, %cst_49 [1] : vector<8x32xf32> to vector<8xf32>
    %119 = vector.shape_cast %118 : vector<8xf32> to vector<8x1xf32>
    %cst_50 = arith.constant 3.200000e+01 : f32
    %120 = vector.broadcast %cst_50 : f32 to vector<8x1xf32>
    %121 = arith.divf %119, %120 : vector<8x1xf32>
    %cst_51 = arith.constant 9.99999996E-13 : f32
    %122 = vector.broadcast %cst_51 : f32 to vector<8x1xf32>
    %123 = arith.addf %121, %122 : vector<8x1xf32>
    %124 = math.rsqrt %123 : vector<8x1xf32>
    %125 = vector.broadcast %114 : vector<8x1xf32> to vector<8x32xf32>
    %126 = arith.subf %108, %125 : vector<8x32xf32>
    %127 = vector.broadcast %124 : vector<8x1xf32> to vector<8x32xf32>
    %128 = arith.mulf %126, %127 : vector<8x32xf32>
    %129 = vector.broadcast %109 : vector<1x32xf32> to vector<8x32xf32>
    %130 = arith.mulf %128, %129 : vector<8x32xf32>
    %131 = vector.broadcast %110 : vector<1x32xf32> to vector<8x32xf32>
    %132 = arith.addf %130, %131 : vector<8x32xf32>
    %133 = arith.truncf %132 : vector<8x32xf32> to vector<8x32xbf16>
    %cst_52 = arith.constant 0.000000e+00 : f32
    %134 = vector.broadcast %cst_52 : f32 to vector<8x32xf32>
    %c0_i32 = arith.constant 0 : i32
    %135 = arith.index_cast %c0_i32 : i32 to index
    %c0_53 = arith.constant 0 : index
    %c0_54 = arith.constant 0 : index
    %136 = vector.load %arg14[%135, %c0_53, %c0_54] : memref<1x32x64xbf16, #tpu.memory_space<vmem>>, vector<1x32x64xbf16>
    %137 = vector.shape_cast %136 : vector<1x32x64xbf16> to vector<32x64xbf16>
    %cst_55 = arith.constant dense<0.000000e+00> : vector<8x64xf32>
    %138 = tpu.matmul %133, %137, %cst_55 {dimension_numbers = #tpu.dot_dimension_numbers<[1], [0], [0], [1], [0, 0, 1, 1], [], []>} : vector<8x32xbf16>, vector<32x64xbf16>, vector<8x64xf32> -> vector<8x64xf32>
    %139 = arith.index_cast %c0_i32 : i32 to index
    %c0_56 = arith.constant 0 : index
    %c0_57 = arith.constant 0 : index
    %140 = vector.load %arg15[%139, %c0_56, %c0_57] : memref<1x1x64xf32, #tpu.memory_space<vmem>>, vector<1x1x64xf32>
    %141 = vector.shape_cast %140 : vector<1x1x64xf32> to vector<1x64xf32>
    %142 = vector.broadcast %141 : vector<1x64xf32> to vector<8x64xf32>
    %143 = arith.addf %138, %142 : vector<8x64xf32>
    %cst_58 = arith.constant 5.000000e-01 : f32
    %144 = vector.broadcast %cst_58 : f32 to vector<8x64xf32>
    %145 = arith.mulf %144, %143 : vector<8x64xf32>
    %cst_59 = arith.constant 0.707106769 : f32
    %146 = vector.broadcast %cst_59 : f32 to vector<8x64xf32>
    %147 = arith.mulf %143, %146 : vector<8x64xf32>
    %148 = math.erf %147 : vector<8x64xf32>
    %cst_60 = arith.constant 1.000000e+00 : f32
    %149 = vector.broadcast %cst_60 : f32 to vector<8x64xf32>
    %150 = arith.addf %149, %148 : vector<8x64xf32>
    %151 = arith.mulf %145, %150 : vector<8x64xf32>
    %152 = arith.truncf %151 : vector<8x64xf32> to vector<8x64xbf16>
    %153 = arith.index_cast %c0_i32 : i32 to index
    %c0_61 = arith.constant 0 : index
    %c0_62 = arith.constant 0 : index
    %154 = vector.load %arg16[%153, %c0_61, %c0_62] : memref<1x64x32xbf16, #tpu.memory_space<vmem>>, vector<1x64x32xbf16>
    %155 = vector.shape_cast %154 : vector<1x64x32xbf16> to vector<64x32xbf16>
    %cst_63 = arith.constant dense<0.000000e+00> : vector<8x32xf32>
    %156 = tpu.matmul %152, %155, %cst_63 {dimension_numbers = #tpu.dot_dimension_numbers<[1], [0], [0], [1], [0, 0, 1, 1], [], []>} : vector<8x64xbf16>, vector<64x32xbf16>, vector<8x32xf32> -> vector<8x32xf32>
    %157 = arith.addf %134, %156 : vector<8x32xf32>
    %c1_i32 = arith.constant 1 : i32
    %c0_64 = arith.constant 0 : index
    %c0_65 = arith.constant 0 : index
    %158 = vector.load %arg17[%c0_64, %c0_65] : memref<1x32xf32, #tpu.memory_space<vmem>>, vector<1x32xf32>
    %159 = vector.broadcast %158 : vector<1x32xf32> to vector<8x32xf32>
    %160 = arith.addf %157, %159 : vector<8x32xf32>
    %161 = arith.addf %160, %132 : vector<8x32xf32>
    %c0_66 = arith.constant 0 : index
    %c0_67 = arith.constant 0 : index
    %162 = vector.load %arg18[%c0_66, %c0_67] : memref<1x32xf32, #tpu.memory_space<vmem>>, vector<1x32xf32>
    %c0_68 = arith.constant 0 : index
    %c0_69 = arith.constant 0 : index
    %163 = vector.load %arg19[%c0_68, %c0_69] : memref<1x32xf32, #tpu.memory_space<vmem>>, vector<1x32xf32>
    %cst_70 = arith.constant dense<0.000000e+00> : vector<8xf32>
    %164 = vector.multi_reduction <add>, %161, %cst_70 [1] : vector<8x32xf32> to vector<8xf32>
    %165 = vector.shape_cast %164 : vector<8xf32> to vector<8x1xf32>
    %cst_71 = arith.constant 3.200000e+01 : f32
    %166 = vector.broadcast %cst_71 : f32 to vector<8x1xf32>
    %167 = arith.divf %165, %166 : vector<8x1xf32>
    %168 = vector.broadcast %167 : vector<8x1xf32> to vector<8x32xf32>
    %169 = arith.subf %161, %168 : vector<8x32xf32>
    %170 = arith.mulf %169, %169 : vector<8x32xf32>
    %cst_72 = arith.constant dense<0.000000e+00> : vector<8xf32>
    %171 = vector.multi_reduction <add>, %170, %cst_72 [1] : vector<8x32xf32> to vector<8xf32>
    %172 = vector.shape_cast %171 : vector<8xf32> to vector<8x1xf32>
    %cst_73 = arith.constant 3.200000e+01 : f32
    %173 = vector.broadcast %cst_73 : f32 to vector<8x1xf32>
    %174 = arith.divf %172, %173 : vector<8x1xf32>
    %cst_74 = arith.constant 9.99999996E-13 : f32
    %175 = vector.broadcast %cst_74 : f32 to vector<8x1xf32>
    %176 = arith.addf %174, %175 : vector<8x1xf32>
    %177 = math.rsqrt %176 : vector<8x1xf32>
    %178 = vector.broadcast %167 : vector<8x1xf32> to vector<8x32xf32>
    %179 = arith.subf %161, %178 : vector<8x32xf32>
    %180 = vector.broadcast %177 : vector<8x1xf32> to vector<8x32xf32>
    %181 = arith.mulf %179, %180 : vector<8x32xf32>
    %182 = vector.broadcast %162 : vector<1x32xf32> to vector<8x32xf32>
    %183 = arith.mulf %181, %182 : vector<8x32xf32>
    %184 = vector.broadcast %163 : vector<1x32xf32> to vector<8x32xf32>
    %185 = arith.addf %183, %184 : vector<8x32xf32>
    %c0_75 = arith.constant 0 : index
    %c0_76 = arith.constant 0 : index
    %c0_77 = arith.constant 0 : index
    %186 = vector.load %arg20[%c0_75, %c0_76, %c0_77] : memref<1x8x32xf32, #tpu.memory_space<vmem>>, vector<1x8x32xf32>
    %187 = vector.shape_cast %186 : vector<1x8x32xf32> to vector<8x32xf32>
    %188 = vector.shape_cast %185 : vector<8x32xf32> to vector<1x8x32xf32>
    tpu.vector_store %arg20[%c0_75, %c0_76, %c0_77], %188 {strides = array<i32>} : memref<1x8x32xf32, #tpu.memory_space<vmem>>, vector<1x8x32xf32>,
    return
  }
  func.func @transform_0(%arg0: i32, %arg1: i32) -> (i32, i32, i32) {
    %c0_i32 = arith.constant 0 : i32
    %c0_i32_0 = arith.constant 0 : i32
    %c0_i32_1 = arith.constant 0 : i32
    return %arg0, %c0_i32, %c0_i32_0 : i32, i32, i32
  }
  func.func @transform_1(%arg0: i32, %arg1: i32) -> (i32, i32, i32) {
    %c0_i32 = arith.constant 0 : i32
    %c0_i32_0 = arith.constant 0 : i32
    %c0_i32_1 = arith.constant 0 : i32
    return %arg0, %c0_i32, %c0_i32_0 : i32, i32, i32
  }
  func.func @transform_2(%arg0: i32, %arg1: i32) -> (i32, i32) {
    %c0_i32 = arith.constant 0 : i32
    %c0_i32_0 = arith.constant 0 : i32
    %c0_i32_1 = arith.constant 0 : i32
    return %c0_i32, %c0_i32_0 : i32, i32
  }
  func.func @transform_3(%arg0: i32, %arg1: i32) -> (i32, i32) {
    %c0_i32 = arith.constant 0 : i32
    %c0_i32_0 = arith.constant 0 : i32
    %c0_i32_1 = arith.constant 0 : i32
    return %c0_i32, %c0_i32_0 : i32, i32
  }
  func.func @transform_4(%arg0: i32, %arg1: i32) -> (i32, i32) {
    %c0_i32 = arith.constant 0 : i32
    %c0_i32_0 = arith.constant 0 : i32
    %c0_i32_1 = arith.constant 0 : i32
    return %c0_i32, %c0_i32_0 : i32, i32
  }
  func.func @transform_5(%arg0: i32, %arg1: i32) -> (i32, i32) {
    %c0_i32 = arith.constant 0 : i32
    %c0_i32_0 = arith.constant 0 : i32
    %c0_i32_1 = arith.constant 0 : i32
    return %c0_i32, %c0_i32_0 : i32, i32
  }
  func.func @transform_6(%arg0: i32, %arg1: i32) -> (i32, i32) {
    %c0_i32 = arith.constant 0 : i32
    %c0_i32_0 = arith.constant 0 : i32
    %c0_i32_1 = arith.constant 0 : i32
    return %c0_i32, %c0_i32_0 : i32, i32
  }
  func.func @transform_7(%arg0: i32, %arg1: i32) -> (i32, i32) {
    %c0_i32 = arith.constant 0 : i32
    %c0_i32_0 = arith.constant 0 : i32
    %c0_i32_1 = arith.constant 0 : i32
    return %c0_i32, %c0_i32_0 : i32, i32
  }
  func.func @transform_8(%arg0: i32, %arg1: i32) -> (i32, i32) {
    %c0_i32 = arith.constant 0 : i32
    %c0_i32_0 = arith.constant 0 : i32
    %c0_i32_1 = arith.constant 0 : i32
    return %c0_i32, %c0_i32_0 : i32, i32
  }
  func.func @transform_9(%arg0: i32, %arg1: i32) -> (i32, i32) {
    %c0_i32 = arith.constant 0 : i32
    %c0_i32_0 = arith.constant 0 : i32
    %c0_i32_1 = arith.constant 0 : i32
    return %c0_i32, %c0_i32_0 : i32, i32
  }
  func.func @transform_10(%arg0: i32, %arg1: i32) -> (i32, i32) {
    %c0_i32 = arith.constant 0 : i32
    %c0_i32_0 = arith.constant 0 : i32
    %c0_i32_1 = arith.constant 0 : i32
    return %c0_i32, %c0_i32_0 : i32, i32
  }
  func.func @transform_11(%arg0: i32, %arg1: i32) -> (i32, i32) {
    %c0_i32 = arith.constant 0 : i32
    %c0_i32_0 = arith.constant 0 : i32
    %c0_i32_1 = arith.constant 0 : i32
    return %c0_i32, %c0_i32_0 : i32, i32
  }
  func.func @transform_12(%arg0: i32, %arg1: i32) -> (i32, i32, i32) {
    %c0_i32 = arith.constant 0 : i32
    %c0_i32_0 = arith.constant 0 : i32
    %c0_i32_1 = arith.constant 0 : i32
    %c0_i32_2 = arith.constant 0 : i32
    return %c0_i32, %c0_i32_0, %c0_i32_1 : i32, i32, i32
  }
  func.func @transform_13(%arg0: i32, %arg1: i32) -> (i32, i32, i32) {
    %c0_i32 = arith.constant 0 : i32
    %c0_i32_0 = arith.constant 0 : i32
    %c0_i32_1 = arith.constant 0 : i32
    %c0_i32_2 = arith.constant 0 : i32
    return %c0_i32, %c0_i32_0, %c0_i32_1 : i32, i32, i32
  }
  func.func @transform_14(%arg0: i32, %arg1: i32) -> (i32, i32, i32) {
    %c0_i32 = arith.constant 0 : i32
    %c0_i32_0 = arith.constant 0 : i32
    %c0_i32_1 = arith.constant 0 : i32
    %c0_i32_2 = arith.constant 0 : i32
    return %c0_i32, %c0_i32_0, %c0_i32_1 : i32, i32, i32
  }
  func.func @transform_15(%arg0: i32, %arg1: i32) -> (i32, i32) {
    %c0_i32 = arith.constant 0 : i32
    %c0_i32_0 = arith.constant 0 : i32
    %c0_i32_1 = arith.constant 0 : i32
    return %c0_i32, %c0_i32_0 : i32, i32
  }
  func.func @transform_16(%arg0: i32, %arg1: i32) -> (i32, i32) {
    %c0_i32 = arith.constant 0 : i32
    %c0_i32_0 = arith.constant 0 : i32
    %c0_i32_1 = arith.constant 0 : i32
    return %c0_i32, %c0_i32_0 : i32, i32
  }
  func.func @transform_17(%arg0: i32, %arg1: i32) -> (i32, i32) {
    %c0_i32 = arith.constant 0 : i32
    %c0_i32_0 = arith.constant 0 : i32
    %c0_i32_1 = arith.constant 0 : i32
    return %c0_i32, %c0_i32_0 : i32, i32
  }
  func.func @transform_18(%arg0: i32, %arg1: i32) -> (i32, i32, i32) {
    %c0_i32 = arith.constant 0 : i32
    %c0_i32_0 = arith.constant 0 : i32
    return %arg0, %arg1, %c0_i32 : i32, i32, i32
  }
}

</mosaic_0001>

<bundles_post_ra>
// kernel: tpu_custom_call.1
= control target key start
LH: loop header
LB: loop body
LE: loop exit
PB: predicated region body
PF: predicated region fallthrough
CT: control target
= control target key end

     0   :  { %s2946_s0 = inlined_call_operand.vmem [shape: f32[2,8,32], index: 0, kind: input, shape index: {}]   ;;  %s2947_s1 = inlined_call_operand.vmem [shape: f32[2,1,8], index: 1, kind: input, shape index: {}]   ;;  %s2948_s2 = inlined_call_operand.vmem [shape: bf16[32,32], index: 2, kind: input, shape index: {}]   ;;  %s2949_s3 = inlined_call_operand.hbm [shape: f32[1,32], index: 3, kind: input, shape index: {}]   ;;  %s2950_s4 = inlined_call_operand.vmem [shape: bf16[32,32], index: 4, kind: input, shape index: {}]   ;;  %s2951_s5 = inlined_call_operand.hbm [shape: f32[1,32], index: 5, kind: input, shape index: {}]   ;;  %s2952_s6 = inlined_call_operand.hbm [shape: bf16[32,32], index: 6, kind: input, shape index: {}]   ;;  %s2953_s7 = inlined_call_operand.hbm [shape: f32[1,32], index: 7, kind: input, shape index: {}]   ;;  %s2954_s8 = inlined_call_operand.hbm [shape: bf16[32,32], index: 8, kind: input, shape index: {}]   ;;  %s2955_s9 = inlined_call_operand.hbm [shape: f32[1,32], index: 9, kind: input, shape index: {}]   ;;  %s2956_s10 = inlined_call_operand.vmem [shape: f32[1,32], index: 10, kind: input, shape index: {}]   ;;  %s2957_s11 = inlined_call_operand.vmem [shape: f32[1,32], index: 11, kind: input, shape index: {}]   ;;  %s2958_s12 = inlined_call_operand.vmem [shape: bf16[1,32,64], index: 12, kind: input, shape index: {}]   ;;  %s2959_s13 = inlined_call_operand.vmem [shape: f32[1,1,64], index: 13, kind: input, shape index: {}]   ;;  %s2960_s14 = inlined_call_operand.vmem [shape: bf16[1,64,32], index: 14, kind: input, shape index: {}]   ;;  %s2961_s15 = inlined_call_operand.vmem [shape: f32[1,32], index: 15, kind: input, shape index: {}]   ;;  %s2962_s16 = inlined_call_operand.vmem [shape: f32[1,32], index: 16, kind: input, shape index: {}]   ;;  %s2963_s17 = inlined_call_operand.vmem [shape: f32[1,32], index: 17, kind: input, shape index: {}]   ;;  %s2964_s18 = inlined_call_operand.hbm [shape: f32[2,8,32], index: 18, kind: output, shape index: {}]  }
   0x1   :  { %2981 = sst [smem:[#allocation28_spill]] %s2946_s0 }
   0x2   :  { %2982 = sst [smem:[#allocation29_spill]] %s2947_s1 }
   0x3   :  { %2983 = sst [smem:[#allocation30_spill]] %s2948_s2 }
   0x4   :  { %2984 = sst [smem:[#allocation31_spill]] %s2949_s3 }
   0x5   :  { %2985 = sst [smem:[#allocation32_spill]] %s2951_s5 }
   0x6   :  { %2986 = sst [smem:[#allocation33_spill]] %s2953_s7 }
   0x7   :  { %2987 = sst [smem:[#allocation34_spill]] %s2962_s16 }
   0x8   :  { %2988 = sst [smem:[#allocation35_spill]] %s2963_s17 }
   0x9   :  { %2989 = sst [smem:[#allocation36_spill]] %s2964_s18 }
   0xa   :  { %23 = vsyncpa [#allocation3], 0 }
   0xb   :  { %24 = vsyncpa [#allocation6], 0 }
   0xc   :  { %25 = vsyncpa [#allocation9], 0 }
   0xd   :  { %26 = vsyncpa [#allocation12], 0 }
   0xe   :  { %27 = vsyncpa [#allocation4], 0 }
   0xf   :  { %29 = vsyncpa [#allocation4 + $0x1], 0  ;;  %s2524_s27 = smov 0   ;;  %s2526_s28 = smov 0  }
  0x10   :  { %s2528_s29 = smov 0   ;;  %s2530_s30 = smov 0  }
  0x11   :  { %s2532_s0 = smov 0   ;;  %s2534_s19 = smov 0  }
  0x12 LB: > { %2990 = sst [smem:[#allocation19_spill]] %s2390_s27  ;;  %s1788_s1 = sadd.s32 4294967295, %s2410_s19   ;;  %s2410_s19 = sphi %s2534_s19, %s35_s19   ;;  %s2406_s0 = sphi %s2532_s0, %s3027_s0   ;;  %s2402_s30 = sphi %s2530_s30, %s3026_s30   ;;  %s2398_s29 = sphi %s2528_s29, %s3025_s29   ;;  %s2394_s28 = sphi %s2526_s28, %s3024_s28   ;;  %s2390_s27 = sphi %s2524_s27, %s3023_s27  }
  0x13   : > { %2991 = sst [smem:[#allocation20_spill]] %s2394_s28  ;;  %s1789_s20 = sadd.s32 4294967294, %s2410_s19  }
  0x14   : > { %2992 = sst [smem:[#allocation21_spill]] %s2398_s29  ;;  %s47_s21 = sadd.s32 1, %s2406_s0 }
  0x15   : > { %2993 = sst [smem:[#allocation22_spill]] %s2406_s0  ;;  %s444_s22 = sadd.s32 1, %s2398_s29 }
  0x16   : > { %2994 = sst [smem:[#allocation23_spill]] %s2410_s19  ;;  %p49_p0 = scmp.ge.s32.totalorder %s47_s21, 2 }
  0x17   : > { %p454_p1 = scmp.ne.s32.totalorder %s2398_s29, %s2394_s28  ;;  %p455_p2 = scmp.eq.s32.totalorder %s1788_s1, 1 }
  0x18   : > { %p460_p3 = scmp.ne.s32.totalorder %s2394_s28, %s2390_s27  ;;  %s3029_s21 = smov (%p49_p0, %s47_s21), 0 }
  0x19   : > { %2995 = sst [smem:[#allocation24_spill]] %s3029_s21  ;;  %p2564_p4 = por %p455_p2, %p454_p1 }
  0x1a   : > { %p461_p5 = scmp.eq.s32.totalorder %s1789_s20, 1  ;;  %s439_s23 = ssub.s32 %s2406_s0, %s3029_s21 }
  0x1b   : > { %s2996_s2 = scalar_select %p2564_p4, 1, 0 }
  0x1c   : > { %p1790_p6 = scmp.ge.s32.totalorder %s2410_s19, 1  ;;  %p442_p7 = scmp.eq.s32.totalorder %s439_s23, 0 }
  0x1d   : > { %2997 = sst [smem:[#allocation25_spill]] %s2996_s2  ;;  %p2571_p8 = por %p461_p5, %p460_p3 }
  0x1e   : > { %p468_p9 = scmp.lt.s32.totalorder %s2410_s19, 3  ;;  %p2583_p11 = scmp.eq.s32.totalorder %s1788_s1, 0 }
  0x1f   : > { %s2998_s24 = scalar_select %p2571_p8, 1, 0 }
  0x20   : > { %s2577_s25 = scalar_select %p442_p7, %s2398_s29, %s444_s22  }
  0x21   : > { %2999 = sst [smem:[#allocation26_spill]] %s2998_s24  ;;  %p2579_p10 = pnand %p1790_p6, %p468_p9 }
  0x22   : > { %3000 = sst [smem:[#allocation27_spill]] %s2577_s25  ;;  %s2412_s20 = smov [#allocation5]  }
  0x23   : > { %s3001_s26 = scalar_select %p2579_p10, 1, 0 }
  0x24   : > { %s3002_s27 = scalar_select %p2583_p11, 1, 0 }
  0x25   : > { %p2012_p12 = pneg %p2579_p10  ;;  %s498_s23 = sshll.u32 %s2412_s20, 4  ;;  %s499_s23 = int_to_ptr.vmem [resolvable:$true] %s498_s23 }
  0x26   : > { %s2413_s21 = smov [#allocation8]   ;;  %s3004_s5 = sld [smem:[#allocation32_spill]] }
  0x27   : > { %s522_s0 = sshll.u32 %s2413_s21, 4  ;;  %p2591_p13 = pnand %p2583_p11, %p2012_p12  ;;  %s2595_s0 = int_to_ptr.vmem [resolvable:$true] %s522_s0 }
  0x29   : > { %p2605_p1 = pneg %p2591_p13 }
  0x2c   : > { %s2148_s29 = scalar_lea.hbm %s3004_s5, 16 }
  0x2d   : > { %p2149_p0 = scmp.ne.s32.totalorder %s3004_s5, %s2148_s29  ;;  %p2155_p5 = scmp.lt.u32.totalorder %s2148_s29, %s3004_s5 }
  0x2f   : > { %p2151_p2 = pnand %p2605_p1, %p2149_p0 }
  0x31   : > { %p2152_p3 = pneg %p2151_p2 }
  0x33   : > { %p2157_p6 = pnand %p2155_p5, %p2152_p3 }
  0x35   : > { %2160 = shalt.err (!%p2157_p6)
}
  0x36   : > { %s2161_s25 = scalar_lea.vmem %s499_s23, 16  ;;  %s2168_s19 = scalar_lea.vmem %s499_s23, 32 }
  0x37   : > { %p2162_p7 = scmp.ne.s32.totalorder %s499_s23, %s2161_s25  ;;  %p2169_p8 = scmp.lt.s32.totalorder %s499_s23, %s499_s23 }
  0x38   : > { %p2170_p4 = scmp.lt.s32.totalorder %s2168_s19, %s2161_s25 }
  0x39   : > { %p2164_p9 = pnand %p2162_p7, %p2605_p1 }
  0x3a   : > { %p2171_p11 = por %p2170_p4, %p2169_p8 }
  0x3b   : > { %p2165_p12 = pneg %p2164_p9 }
  0x3d   : > { %p2172_p10 = pnand %p2171_p11, %p2165_p12 }
  0x3f   : > { %2175 = shalt.err (!%p2172_p10)
}
  0x40   : > { %2018 = dma.hbm_to_vmem [thread:$0]  (!%p2591_p13), %s3004_s5, 16, %s499_s23, [#allocation6]  }
  0x41   : > { %s3006_s7 = sld [smem:[#allocation33_spill]] }
  0x47   : > { %s2176_s21 = scalar_lea.hbm %s3006_s7, 16 }
  0x48   : > { %p2177_p0 = scmp.ne.s32.totalorder %s3006_s7, %s2176_s21  ;;  %p2183_p8 = scmp.lt.u32.totalorder %s2176_s21, %s3006_s7 }
  0x4a   : > { %p2179_p2 = pnand %p2177_p0, %p2605_p1 }
  0x4c   : > { %p2180_p4 = pneg %p2179_p2 }
  0x4e   : > { %p2185_p10 = pnand %p2183_p8, %p2180_p4 }
  0x50   : > { %2188 = shalt.err (!%p2185_p10)
}
  0x51   : > { %s2189_s23 = scalar_lea.vmem %s2595_s0, 16  ;;  %s2196_s16 = scalar_lea.vmem %s2595_s0, 32 }
  0x52   : > { %p2190_p11 = scmp.ne.s32.totalorder %s2595_s0, %s2189_s23  ;;  %p2197_p6 = scmp.lt.s32.totalorder %s2595_s0, %s2595_s0 }
  0x53   : > { %p2198_p7 = scmp.lt.s32.totalorder %s2196_s16, %s2189_s23 }
  0x54   : > { %p2192_p3 = pnand %p2190_p11, %p2605_p1 }
  0x55   : > { %p2199_p9 = por %p2198_p7, %p2197_p6 }
  0x56   : > { %p2193_p5 = pneg %p2192_p3 }
  0x58   : > { %p2200_p12 = pnand %p2199_p9, %p2193_p5 }
  0x5a   : > { %2203 = shalt.err (!%p2200_p12)
}
  0x5b   : > { %2024 = dma.hbm_to_vmem [thread:$0]  (!%p2591_p13), %s3006_s7, 16, %s2595_s0, [#allocation9]  }
  0x5c   : > { %s2414_s1 = smov [#allocation2]   ;;  %s2415_s29 = smov [#allocation7]  }
  0x5d   : > { %s484_s18 = sshll.u32 %s2414_s1, 4  ;;  %s508_s21 = sshll.u32 %s2415_s29, 4  ;;  %s485_s18 = int_to_ptr.vmem [resolvable:$true] %s484_s18  ;;  %s509_s21 = int_to_ptr.vmem [resolvable:$true] %s508_s21 }
  0x5e   : > { %s3007_s3 = sld [smem:[#allocation31_spill]] }
  0x64   : > { %s2204_s23 = scalar_lea.hbm %s3007_s3, 16 }
  0x65   : > { %p2205_p0 = scmp.ne.s32.totalorder %s3007_s3, %s2204_s23  ;;  %p2211_p8 = scmp.lt.u32.totalorder %s2204_s23, %s3007_s3 }
  0x67   : > { %p2207_p2 = pnand %p2205_p0, %p2605_p1 }
  0x69   : > { %p2208_p4 = pneg %p2207_p2 }
  0x6b   : > { %p2213_p10 = pnand %p2211_p8, %p2208_p4 }
  0x6d   : > { %2216 = shalt.err (!%p2213_p10)
}
  0x6e   : > { %s2217_s0 = scalar_lea.vmem %s485_s18, 16  ;;  %s2224_s24 = scalar_lea.vmem %s485_s18, 32 }
  0x6f   : > { %p2218_p11 = scmp.ne.s32.totalorder %s485_s18, %s2217_s0  ;;  %p2225_p6 = scmp.lt.s32.totalorder %s485_s18, %s485_s18 }
  0x70   : > { %p2226_p7 = scmp.lt.s32.totalorder %s2224_s24, %s2217_s0 }
  0x71   : > { %p2220_p3 = pnand %p2218_p11, %p2605_p1 }
  0x72   : > { %p2227_p9 = por %p2226_p7, %p2225_p6 }
  0x73   : > { %p2221_p5 = pneg %p2220_p3 }
  0x75   : > { %p2228_p12 = pnand %p2227_p9, %p2221_p5 }
  0x77   : > { %2231 = shalt.err (!%p2228_p12)
}
  0x78   : > { %2015 = dma.hbm_to_vmem [thread:$0]  (!%p2591_p13), %s3007_s3, 16, %s485_s18, [#allocation3]  }
  0x79   : > { %s2232_s25 = scalar_lea.hbm %s2952_s6, 256 }
  0x7a   : > { %p2233_p0 = scmp.ne.s32.totalorder %s2952_s6, %s2232_s25  ;;  %p2239_p8 = scmp.lt.u32.totalorder %s2232_s25, %s2952_s6 }
  0x7c   : > { %p2235_p2 = pnand %p2233_p0, %p2605_p1 }
  0x7e   : > { %p2236_p4 = pneg %p2235_p2 }
  0x80   : > { %p2241_p10 = pnand %p2239_p8, %p2236_p4 }
  0x82   : > { %2244 = shalt.err (!%p2241_p10)
}
  0x83   : > { %s2245_s0 = scalar_lea.vmem %s509_s21, 256  ;;  %p2253_p6 = scmp.lt.s32.totalorder %s509_s21, %s509_s21 }
  0x84   : > { %p2246_p11 = scmp.ne.s32.totalorder %s509_s21, %s2245_s0  ;;  %p2254_p7 = scmp.lt.s32.totalorder %s2245_s0, %s2245_s0 }
  0x86   : > { %p2248_p3 = pnand %p2246_p11, %p2605_p1  ;;  %p2255_p9 = por %p2254_p7, %p2253_p6 }
  0x88   : > { %p2249_p5 = pneg %p2248_p3 }
  0x8a   : > { %p2256_p12 = pnand %p2255_p9, %p2249_p5 }
  0x8c   : > { %2259 = shalt.err (!%p2256_p12)
}
  0x8d   : > { %s2416_s18 = smov 64   ;;  %s2417_s24 = smov 4  }
  0x8e   : > { %2021 = dma.hbm_to_vmem [thread:$0]  (!%p2591_p13), %s2952_s6, 256, %s509_s21, [#allocation6], %s2416_s18, %s2416_s18, %s2417_s24  }
  0x8f   : > { %s2418_s2 = smov [#allocation10]   ;;  %s2419_s25 = smov [#allocation11]  }
  0x90   : > { %s532_s29 = sshll.u32 %s2418_s2, 4  ;;  %s546_s19 = sshll.u32 %s2419_s25, 4  ;;  %s533_s29 = int_to_ptr.vmem [resolvable:$true] %s532_s29  ;;  %s547_s19 = int_to_ptr.vmem [resolvable:$true] %s546_s19 }
  0x91   : > { %s2260_s17 = scalar_lea.hbm %s2954_s8, 256 }
  0x92   : > { %p2261_p0 = scmp.ne.s32.totalorder %s2954_s8, %s2260_s17  ;;  %p2267_p8 = scmp.lt.u32.totalorder %s2260_s17, %s2954_s8 }
  0x94   : > { %p2263_p2 = pnand %p2261_p0, %p2605_p1 }
  0x96   : > { %p2264_p4 = pneg %p2263_p2 }
  0x98   : > { %p2269_p10 = pnand %p2267_p8, %p2264_p4 }
  0x9a   : > { %2272 = shalt.err (!%p2269_p10)
}
  0x9b   : > { %s2273_s21 = scalar_lea.vmem %s533_s29, 256  ;;  %p2281_p6 = scmp.lt.s32.totalorder %s533_s29, %s533_s29 }
  0x9c   : > { %p2274_p11 = scmp.ne.s32.totalorder %s533_s29, %s2273_s21  ;;  %p2282_p7 = scmp.lt.s32.totalorder %s2273_s21, %s2273_s21 }
  0x9e   : > { %p2276_p3 = pnand %p2274_p11, %p2605_p1  ;;  %p2283_p9 = por %p2282_p7, %p2281_p6 }
  0xa0   : > { %p2277_p5 = pneg %p2276_p3 }
  0xa2   : > { %p2284_p12 = pnand %p2283_p9, %p2277_p5 }
  0xa4   : > { %2287 = shalt.err (!%p2284_p12)
}
  0xa5   : > { %2027 = dma.hbm_to_vmem [thread:$0]  (!%p2591_p13), %s2954_s8, 256, %s533_s29, [#allocation9], %s2416_s18, %s2416_s18, %s2417_s24  }
  0xa6   : > { %s2288_s1 = scalar_lea.hbm %s2955_s9, 16 }
  0xa7   : > { %p2289_p0 = scmp.ne.s32.totalorder %s2955_s9, %s2288_s1  ;;  %p2295_p8 = scmp.lt.u32.totalorder %s2288_s1, %s2955_s9 }
  0xa9   : > { %p2291_p2 = pnand %p2289_p0, %p2605_p1 }
  0xab   : > { %p2292_p4 = pneg %p2291_p2 }
  0xad   : > { %p2297_p10 = pnand %p2295_p8, %p2292_p4 }
  0xaf   : > { %2300 = shalt.err (!%p2297_p10)
}
  0xb0   : > { %s2301_s17 = scalar_lea.vmem %s547_s19, 16  ;;  %s2308_s18 = scalar_lea.vmem %s547_s19, 32 }
  0xb1   : > { %p2302_p11 = scmp.ne.s32.totalorder %s547_s19, %s2301_s17  ;;  %p2309_p6 = scmp.lt.s32.totalorder %s547_s19, %s547_s19 }
  0xb2   : > { %p2310_p7 = scmp.lt.s32.totalorder %s2308_s18, %s2301_s17 }
  0xb3   : > { %p2304_p3 = pnand %p2302_p11, %p2605_p1 }
  0xb4   : > { %p2311_p9 = por %p2310_p7, %p2309_p6 }
  0xb5   : > { %p2305_p5 = pneg %p2304_p3 }
  0xb7   : > { %p2312_p12 = pnand %p2311_p9, %p2305_p5 }
  0xb9   : > { %2315 = shalt.err (!%p2312_p12)
}
  0xba   : > { %2030 = dma.hbm_to_vmem [thread:$0]  (!%p2591_p13), %s2955_s9, 16, %s547_s19, [#allocation12]  }
  0xbb   : > { %p3008_p0 = scmp.ne.s32.totalorder %s3001_s26, 0 }
  0xbc   : > { %p3009_p2 = scmp.ne.s32.totalorder (!%p3008_p0), %s3002_s27, 0 }
  0xbd   : > { %596 = sbr.rel (%p3008_p0) target bundleno = 2737 (0xab1), region = 92 }
  0xc4   : > { %2369 = dma.done.wait (%p3009_p2), [#allocation3], 16  }
  0xc5   : > { %2371 = vsyncadd (%p3009_p2), [#allocation3], 4294967280 }
  0xc6   : > { %2373 = dma.done.wait (%p3009_p2), [#allocation6], 272  }
  0xc7   : > { %2375 = vsyncadd (%p3009_p2), [#allocation6], 4294967024 }
  0xc8   : > { %2377 = dma.done.wait (%p3009_p2), [#allocation9], 272  }
  0xc9   : > { %2379 = vsyncadd (%p3009_p2), [#allocation9], 4294967024 }
  0xca   : > { %2381 = dma.done.wait (%p3009_p2), [#allocation12], 16  }
  0xcb   : > { %2383 = vsyncadd (%p3009_p2), [#allocation12], 4294967280  ;;  %p672_p13 = scmp.lt.s32.totalorder %s2402_s30, 1  ;;  %v2420_v0 = vmov 0.0   ;;  %vm2421_vm0 = vmmov 0   ;;  %v2112_v1 = vld [vmem:[%s2950_s4] sm:$0xff]  }
  0xcc   : > { %1894 = vmatprep.subr.bf16.mxu1 %v2420_v0  ;;  %1886 = vmatprep.subr.bf16.mxu0 %v2420_v0  ;;  %s3010_s21 = sld [smem:[#allocation30_spill]]  ;;  %s3011_s7 = sld [smem:[#allocation28_spill]]  ;;  %v2114_v3 = vld [vmem:[%s2950_s4 + $0x8] sm:$0xff]   ;;  %vm709_vm1 = vcmask 261120   ;;  %v1811_v7 = vld [vmem:[#allocation5] ss:$0 sm:$0xff] }
  0xcd   : > { %1898 = vmatprep.mubr.msk.bf16.mxu1 %vm2421_vm0, %v2420_v0  ;;  %s2741_s26 = scalar_select %p672_p13, %s2402_s30, 1  ;;  %1890 = vmatprep.mubr.msk.bf16.mxu0 %vm2421_vm0, %v2420_v0  ;;  %v1807_v8 = vld [vmem:[#allocation2] ss:$0 sm:$0xff]  ;;  %vm893_vm2 = vcmask 64512   ;;  %v2116_v23 = vld [vmem:[#allocation7] sm:$0xff]   ;;  %v2117_v24 = vld [vmem:[#allocation7 + $0x8] sm:$0xff]  }
  0xce   : > { %1895 = vmatpush3.bf16.msra.mxu1 %v2112_v1  ;;  %s2422_s16 = smov 112   ;;  %s2423_s17 = smov 120   ;;  %v1815_v41 = vld [vmem:[#allocation8] ss:$0 sm:$0xff]  ;;  %vm955_vm3 = vcmask 1043456   ;;  %vm1345_vm4 = vcmask 130048  }
  0xcf   : > { %s1806_s27 = sshll.u32 %s2741_s26, 3  ;;  %1896 = vmatprep.subr.bf16.mxu1 %v2420_v0  ;;  %s2424_s18 = smov 104   ;;  %vm1347_vm5 = vcmask 195584   ;;  %vm1559_vm6 = vcmask 523264  }
  0xd0   : > { %s2426_s20 = smov 16   ;;  %s2427_s19 = smov 24  }
  0xd1   : > { %s3013_s3 = sld [smem:[#allocation20_spill]]  ;;  %s3015_s25 = sld [smem:[#allocation34_spill]] }
  0xd2   : > { %v2113_v2 = vld [vmem:[%s3010_s21] sm:$0xff]   ;;  %s675_s28 = scalar_lea.vmem %s3011_s7, %s1806_s27  ;;  %v2115_v4 = vld [vmem:[%s3010_s21 + $0x8] sm:$0xff]   ;;  %1897 = vmatpush3.bf16.msra.mxu1 %v2114_v3  ;;  %s3012_s27 = sld [smem:[#allocation29_spill]] }
  0xd3   : > { %1887 = vmatpush3.bf16.msra.mxu0 %v2113_v2  ;;  %v2763_v5 = vld [vmem:[%s675_s28] sm:$0xff]  ;;  %1910 = vmatprep.subr.bf16.mxu1 %v2420_v0  ;;  %s3014_s28 = sld [smem:[#allocation25_spill]] }
  0xd4   : > { %1888 = vmatprep.subr.bf16.mxu0 %v2420_v0  ;;  %v685_v6 = vpack.c.bf16 %v2763_v5, %v2763_v5 }
  0xd6   : > { %1899 = vmatmul.mubr.msk.bf16.vlgmr.msra.gmra.mrb[0].mxu1 %vm709_vm1, %v685_v6 }
  0xd7   : > { %1889 = vmatpush3.bf16.msra.mxu0 %v2115_v4  ;;  %1912 = vmatprep.mubr.msk.bf16.mxu1 %vm2421_vm0, %v2420_v0  ;;  %s669_s5 = sand.u32 1, %s3013_s3  }
  0xd8   : > { %1902 = vmatprep.subr.bf16.mxu0 %v2420_v0  ;;  %s678_s22 = scalar_lea.vmem %s3012_s27, %s2741_s26  ;;  %s2425_s26 = smov 8  }
  0xd9   : > { %v1819_v34 = vld [vmem:[%s678_s22] ss:$0 sm:$0xff]  ;;  %s1805_s7 = sshll.u32 %s669_s5, 3  ;;  %p3018_p4 = scmp.ne.s32.totalorder %s3014_s28, 0 }
  0xda   : > { %1891 = vmatmul.mubr.msk.bf16.vlgmr.msra.gmra.mrb[0].mxu0 %vm709_vm1, %v685_v6  ;;  %s671_s24 = scalar_lea.vmem [#allocation13], %s1805_s7 }
  0xdb   : > { %1906 = vmatprep.mubr.msk.bf16.mxu0 %vm2421_vm0, %v2420_v0  ;;  %1903 = vmatpush3.bf16.msra.mxu0 %v2116_v23  ;;  %s1649_s29 = sshll.u32 %s671_s24, 4  ;;  %s2900_s29 = int_to_ptr.vmem [resolvable:$true] %s1649_s29 }
  0xdc   : > { %1904 = vmatprep.subr.bf16.mxu0 %v2420_v0  ;;  %s2316_s0 = scalar_lea.vmem %s2900_s29, 128 }
  0xdd   : > { %p2317_p1 = scmp.ne.s32.totalorder %s2900_s29, %s2316_s0 }
  0xdf   : > { %1905 = vmatpush3.bf16.msra.mxu0 %v2117_v24  ;;  %p2318_p8 = pnand %p2317_p1, %p3018_p4 }
  0xe0   : > { %1916 = vmatprep.subr.bf16.mxu0 %v2420_v0 }
  0xe1   : > { %p2319_p10 = pneg %p2318_p8 }
  0xe2   : > { %1907 = vmatmul.mubr.msk.bf16.vlgmr.msra.gmra.mrb[4].mxu0 %vm709_vm1, %v685_v6 }
  0xe3   : > { %1918 = vmatprep.mubr.msk.bf16.mxu0 %vm2421_vm0, %v2420_v0 }
 0x1a9   : > { %v815_v9 = vpop.f32.mrb[0].mxu1 }
 0x1aa   : > { %v816_v10 = vadd.f32 %v1811_v7, %v815_v9  ;;  %v1900_v11 = vpop.f32.mrb[1].mxu1 }
 0x1ab   : > { %v818_v14 = vpop.f32.mrb[2].mxu1 }
 0x1ac   : > { %v821_v16 = vpack.c.bf16 %v816_v10, %v816_v10  ;;  %v1901_v17 = vpop.f32.mrb[3].mxu1 }
 0x1ad   : > { %v747_v12 = vpop.f32.mrb[0].mxu0 }
 0x1ae   : > { %v748_v13 = vadd.f32 %v1807_v8, %v747_v12  ;;  %v1892_v15 = vpop.f32.mrb[1].mxu0  ;;  %1114 = vrot.lane.b32.xlu1 %v821_v16, %s2422_s16  ;;  %1003 = vrot.lane.b32.xlu0 %v821_v16, %s2423_s17  ;;  %v898_v21 = vsel %vm893_vm2, %v821_v16, 0 }
 0x1af   : > { %v750_v18 = vpop.f32.mrb[2].mxu0  ;;  %1911 = vmatpush3.bf16.xpose.msra.mxu1 %v898_v21 }
 0x1b0   : > { %v753_v19 = vmul.f32 0.35355338, %v748_v13  ;;  %v1893_v20 = vpop.f32.mrb[3].mxu0  ;;  %1922 = vmatprep.subr.bf16.mxu1 %v2420_v0 }
 0x1b2   : > { %v754_v22 = vpack.c.bf16 %v753_v19, %v753_v19 }
 0x1b4   : > { %1112 = vrot.lane.b32.xlu1 %v754_v22, %s2422_s16  ;;  %1000 = vrot.lane.b32.xlu0 %v754_v22, %s2423_s17 }
 0x1b5   : > { %v879_v42 = vpop.f32.mrb[4].mxu0 }
 0x1b6   : > { %1913 = vmatmul.mubr.msk.bf16.vlgmr.msra.gmra.mrb[4].mxu1 %vm893_vm2, %v754_v22  ;;  %v880_v43 = vadd.f32 %v1815_v41, %v879_v42  ;;  %v1908_v44 = vpop.f32.mrb[5].mxu0 }
 0x1b7   : > { %1924 = vmatprep.mubr.msk.bf16.mxu1 %vm2421_vm0, %v2420_v0  ;;  %v882_v45 = vpop.f32.mrb[6].mxu0 }
 0x1b8   : > { %1222 = vrot.lane.b32.xlu1 %v754_v22, %s2424_s18  ;;  %1224 = vrot.lane.b32.xlu0 %v821_v16, %s2424_s18  ;;  %v885_v46 = vpack.c.bf16 %v880_v43, %v880_v43  ;;  %v1909_v47 = vpop.f32.mrb[7].mxu0 }
 0x1ba   : > { %v957_v48 = vsel %vm955_vm3, %v885_v46, 0 }
 0x1bb   : > { %1917 = vmatpush3.bf16.msra.mxu0 %v957_v48 }
 0x1bc   : > { %1928 = vmatprep.subr.bf16.mxu0 %v2420_v0 }
 0x220   : > { %v1004_v25 = vpop.permute.xlu0 %1003  ;;  %v1115_v27 = vpop.permute.xlu1 %1114 }
 0x221   : > { %v1009_v26 = vsel %vm893_vm2, %v1004_v25, 0  ;;  %v1120_v29 = vsel %vm893_vm2, %v1115_v27, 0 }
 0x222   : > { %1923 = vmatpush3.bf16.xpose.msra.mxu1 %v1009_v26 }
 0x223   : > { %1934 = vmatprep.subr.bf16.mxu1 %v2420_v0 }
 0x226   : > { %v1001_v28 = vpop.permute.xlu0 %1000  ;;  %v1113_v31 = vpop.permute.xlu1 %1112 }
 0x229   : > { %1925 = vmatmul.mubr.msk.bf16.vlgmr.msra.gmra.mrb[8].mxu1 %vm893_vm2, %v1001_v28 }
 0x22a   : > { %1935 = vmatpush3.bf16.xpose.msra.mxu1 %v1120_v29  ;;  %1936 = vmatprep.mubr.msk.bf16.mxu1 %vm2421_vm0, %v2420_v0  ;;  %v1225_v30 = vpop.permute.xlu0 %1224  ;;  %v1223_v33 = vpop.permute.xlu1 %1222 }
 0x22b   : > { %1946 = vmatprep.subr.bf16.mxu1 %v2420_v0  ;;  %v1230_v32 = vsel %vm893_vm2, %v1225_v30, 0 }
 0x231   : > { %1937 = vmatmul.mubr.msk.bf16.vlgmr.msra.gmra.mrb[12].mxu1 %vm893_vm2, %v1113_v31 }
 0x232   : > { %1947 = vmatpush3.bf16.xpose.msra.mxu1 %v1230_v32  ;;  %1948 = vmatprep.mubr.msk.bf16.mxu1 %vm2421_vm0, %v2420_v0 }
 0x233   : > { %1958 = vmatprep.subr.bf16.mxu1 %v2420_v0 }
 0x239   : > { %1949 = vmatmul.mubr.msk.bf16.vlgmr.msra.gmra.mrb[16].mxu1 %vm893_vm2, %v1223_v33 }
 0x23a   : > { %1962 = vmatprep.mubr.msk.bf16.mxu1 %vm2421_vm0, %v2420_v0 }
 0x289   : > { %v934_v35 = vpop.f32.mrb[4].mxu1 }
 0x28a   : > { %v935_v36 = vadd.f32 %v1819_v34, %v934_v35  ;;  %v1914_v37 = vpop.f32.mrb[5].mxu1 }
 0x28b   : > { %v937_v38 = vpop.f32.mrb[6].mxu1 }
 0x28c   : > { %v1915_v39 = vpop.f32.mrb[7].mxu1  ;;  %v940_v40 = vsel %vm893_vm2, %v935_v36, -inf }
 0x28d   : > { %941 = vmax.xlane.f32.xlu0 %v940_v40 }
 0x2fc   : > { %v1045_v49 = vpop.f32.mrb[8].mxu1 }
 0x2fd   : > { %v1046_v50 = vadd.f32 %v1819_v34, %v1045_v49  ;;  %v1926_v51 = vpop.f32.mrb[9].mxu1 }
 0x2fe   : > { %v1048_v52 = vpop.f32.mrb[10].mxu1  ;;  %v2118_v51 = vld [vmem:[#allocation10] sm:$0xff]  }
 0x2ff   : > { %v1927_v53 = vpop.f32.mrb[11].mxu1  ;;  %v1051_v54 = vsel %vm893_vm2, %v1046_v50, -inf  ;;  %1959 = vmatpush3.bf16.msra.mxu1 %v2118_v51 }
 0x300   : > { %1052 = vmax.xlane.f32.xlu1 %v1051_v54  ;;  %1960 = vmatprep.subr.bf16.mxu1 %v2420_v0 }
 0x304   : > { %v1156_v55 = vpop.f32.mrb[12].mxu1 }
 0x305   : > { %v1157_v56 = vadd.f32 %v1819_v34, %v1156_v55  ;;  %v1938_v57 = vpop.f32.mrb[13].mxu1 }
 0x306   : > { %v1159_v58 = vpop.f32.mrb[14].mxu1 }
 0x307   : > { %v1939_v59 = vpop.f32.mrb[15].mxu1  ;;  %v1162_v60 = vsel %vm893_vm2, %v1157_v56, -inf }
 0x308   : > { %1163 = vmax.xlane.f32.xlu0 %v1162_v60 }
 0x30c   : > { %v1266_v61 = vpop.f32.mrb[16].mxu1 }
 0x30d   : > { %v1267_v62 = vadd.f32 %v1819_v34, %v1266_v61  ;;  %v1950_v63 = vpop.f32.mrb[17].mxu1 }
 0x30e   : > { %v1269_v1 = vpop.f32.mrb[18].mxu1 }
 0x30f   : > { %v1951_v2 = vpop.f32.mrb[19].mxu1  ;;  %v1272_v3 = vsel %vm893_vm2, %v1267_v62, -inf }
 0x310   : > { %1273 = vmax.xlane.f32.xlu0 %v1272_v3 }
 0x31a   : > { %v942_v4 = vpop.xlane.xlu0 %941 }
 0x31b   : > { %v943_v6 = vsub.f32 %v935_v36, %v942_v4 }
 0x31d   : > { %v944_v7 = vmul.f32 1.442695, %v943_v6 }
 0x31f   : > { %2126 = vpow2.f32 %v944_v7 }
 0x329   : > { %v2127_v8 = vpop.eup %2126 }
 0x32a   : > { %v946_v9 = vsel %vm893_vm2, %v2127_v8, 0.0 }
 0x32b   : > { %947 = vadd.xlane.f32.xlu1 %v946_v9 }
 0x33c   : > { %1064 = vrot.lane.b32.xlu1 %v885_v46, %s2423_s17  ;;  %s3016_s17 = sld [smem:[#allocation35_spill]] }
 0x38d   : > { %v1053_v10 = vpop.xlane.xlu1 %1052 }
 0x38e   : > { %v1054_v11 = vsub.f32 %v1046_v50, %v1053_v10  ;;  %v1828_v10 = vld [vmem:[#allocation11] ss:$0 sm:$0xff] }
 0x390   : > { %v1055_v12 = vmul.f32 1.442695, %v1054_v11 }
 0x392   : > { %2128 = vpow2.f32 %v1055_v12 }
 0x395   : > { %v1164_v13 = vpop.xlane.xlu0 %1163 }
 0x396   : > { %v1165_v14 = vsub.f32 %v1157_v56, %v1164_v13  ;;  %v2119_v56 = vld [vmem:[#allocation10 + $0x8] sm:$0xff]  }
 0x397   : > { %1961 = vmatpush3.bf16.msra.mxu1 %v2119_v56 }
 0x398   : > { %v1166_v15 = vmul.f32 1.442695, %v1165_v14  ;;  %1974 = vmatprep.subr.bf16.mxu1 %v2420_v0 }
 0x39a   : > { %2130 = vpow2.f32 %v1166_v15 }
 0x39c   : > { %v2129_v16 = vpop.eup %2128 }
 0x39d   : > { %v1274_v17 = vpop.xlane.xlu0 %1273  ;;  %v1057_v18 = vsel %vm893_vm2, %v2129_v16, 0.0 }
 0x39e   : > { %v1275_v19 = vsub.f32 %v1267_v62, %v1274_v17  ;;  %1058 = vadd.xlane.f32.xlu0 %v1057_v18 }
 0x3a0   : > { %v1276_v20 = vmul.f32 1.442695, %v1275_v19 }
 0x3a2   : > { %2132 = vpow2.f32 %v1276_v20 }
 0x3a4   : > { %v2131_v21 = vpop.eup %2130 }
 0x3a5   : > { %v1168_v22 = vsel %vm893_vm2, %v2131_v21, 0.0 }
 0x3a6   : > { %1169 = vadd.xlane.f32.xlu1 %v1168_v22 }
 0x3ac   : > { %v2133_v23 = vpop.eup %2132 }
 0x3ad   : > { %v1278_v24 = vsel %vm893_vm2, %v2133_v23, 0.0 }
 0x3ae   : > { %1279 = vadd.xlane.f32.xlu0 %v1278_v24  ;;  %v2121_v24 = vld [vmem:[%s2958_s12 + $0x8] sm:$0xff]  }
 0x3b7   : > { %1284 = vrot.lane.b32.xlu1 %v885_v46, %s2424_s18  ;;  %s1847_s18 = sshll.u32 %s2402_s30, 7  ;;  %s2428_s30 = smov [#allocation13]  }
 0x3b8   : > { %v948_v25 = vpop.xlane.xlu1 %947  ;;  %s2320_s3 = sshll.u32 %s2428_s30, 4  ;;  %s2321_s3 = int_to_ptr.vmem [resolvable:$false] %s2320_s3 }
 0x3b9   : > { %2134 = vrcp.f32 %v948_v25  ;;  %s2322_s7 = scalar_lea.vmem %s2321_s3, 256  ;;  %p2323_p11 = scmp.lt.s32.totalorder %s2900_s29, %s2321_s3 }
 0x3ba   : > { %p2324_p3 = scmp.lt.s32.totalorder %s2322_s7, %s2316_s0 }
 0x3bc   : > { %v1065_v27 = vpop.permute.xlu1 %1064  ;;  %p2325_p5 = por %p2324_p3, %p2323_p11 }
 0x3bd   : > { %v1070_v30 = vsel %vm955_vm3, %v1065_v27, 0 }
 0x3be   : > { %p2326_p6 = pnand %p2325_p5, %p2319_p10 }
 0x3c3   : > { %v2135_v26 = vpop.eup %2134 }
 0x3c4   : > { %1174 = vrot.lane.b32.xlu0 %v885_v46, %s2422_s16  ;;  %v950_v28 = vmul.f32 %v2135_v26, %v2127_v8 }
 0x3c6   : > { %v951_v29 = vpack.c.bf16 %v950_v28, %v950_v28  ;;  %v1832_v28 = vld [vmem:[%s2956_s10] ss:$0 sm:$0xff] }
 0x3c8   : > { %1919 = vmatmul.mubr.msk.bf16.vlgmr.msra.gmra.mrb[8].mxu0 %vm893_vm2, %v951_v29 }
 0x3c9   : > { %1929 = vmatpush3.bf16.msra.mxu0 %v1070_v30  ;;  %1930 = vmatprep.mubr.msk.bf16.mxu0 %vm2421_vm0, %v2420_v0  ;;  %v1833_v30 = vld [vmem:[%s2957_s11] ss:$0 sm:$0xff] }
 0x3ca   : > { %1940 = vmatprep.subr.bf16.mxu0 %v2420_v0 }
 0x42b   : > { %v1059_v31 = vpop.xlane.xlu0 %1058 }
 0x42c   : > { %2136 = vrcp.f32 %v1059_v31 }
 0x433   : > { %v1170_v32 = vpop.xlane.xlu1 %1169 }
 0x434   : > { %2138 = vrcp.f32 %v1170_v32 }
 0x436   : > { %v2137_v33 = vpop.eup %2136 }
 0x437   : > { %v1061_v34 = vmul.f32 %v2137_v33, %v2129_v16  ;;  %v1285_v41 = vpop.permute.xlu1 %1284 }
 0x438   : > { %v1290_v43 = vsel %vm955_vm3, %v1285_v41, 0 }
 0x439   : > { %v1062_v35 = vpack.c.bf16 %v1061_v34, %v1061_v34  ;;  %v2122_v34 = vld [vmem:[%s2960_s14] sm:$0xff]  }
 0x43b   : > { %v1280_v36 = vpop.xlane.xlu0 %1279  ;;  %1931 = vmatmul.mubr.msk.bf16.vlgmr.msra.gmra.mrb[12].mxu0 %vm893_vm2, %v1062_v35  ;;  %v2123_v35 = vld [vmem:[%s2960_s14 + $0x8] sm:$0xff]  }
 0x43c   : > { %2140 = vrcp.f32 %v1280_v36  ;;  %1942 = vmatprep.mubr.msk.bf16.mxu0 %vm2421_vm0, %v2420_v0  ;;  %v2124_v36 = vld [vmem:[%s2960_s14 + $0x10] sm:$0xff]  }
 0x43e   : > { %v2139_v37 = vpop.eup %2138 }
 0x43f   : > { %v1172_v38 = vmul.f32 %v2139_v37, %v2131_v21  ;;  %v1175_v39 = vpop.permute.xlu0 %1174  ;;  %v2125_v37 = vld [vmem:[%s2960_s14 + $0x18] sm:$0xff]  }
 0x440   : > { %v1180_v40 = vsel %vm955_vm3, %v1175_v39, 0 }
 0x441   : > { %1941 = vmatpush3.bf16.msra.mxu0 %v1180_v40  ;;  %v1173_v42 = vpack.c.bf16 %v1172_v38, %v1172_v38  ;;  %v1834_v38 = vld [vmem:[%s2959_s13] ss:$0 sm:$0xff] }
 0x442   : > { %1952 = vmatprep.subr.bf16.mxu0 %v2420_v0 }
 0x444   : > { %1943 = vmatmul.mubr.msk.bf16.vlgmr.msra.gmra.mrb[16].mxu0 %vm893_vm2, %v1173_v42 }
 0x445   : > { %1953 = vmatpush3.bf16.msra.mxu0 %v1290_v43  ;;  %1954 = vmatprep.mubr.msk.bf16.mxu0 %vm2421_vm0, %v2420_v0 }
 0x446   : > { %v2141_v44 = vpop.eup %2140  ;;  %1966 = vmatprep.subr.bf16.mxu0 %v2420_v0 }
 0x447   : > { %v1282_v45 = vmul.f32 %v2141_v44, %v2133_v23  ;;  %v2120_v23 = vld [vmem:[%s2958_s12] sm:$0xff]  }
 0x449   : > { %v1283_v46 = vpack.c.bf16 %v1282_v45, %v1282_v45 }
 0x44c   : > { %1955 = vmatmul.mubr.msk.bf16.vlgmr.msra.gmra.mrb[20].mxu0 %vm893_vm2, %v1283_v46 }
 0x44d   : > { %1970 = vmatprep.mubr.msk.bf16.mxu0 %vm2421_vm0, %v2420_v0  ;;  %1967 = vmatpush3.bf16.msra.mxu0 %v2120_v23 }
 0x44e   : > { %1968 = vmatprep.subr.bf16.mxu0 %v2420_v0 }
 0x451   : > { %1969 = vmatpush3.bf16.msra.mxu0 %v2121_v24 }
 0x49b   : > { %v993_v47 = vpop.f32.mrb[8].mxu0 }
 0x49c   : > { %v1920_v48 = vpop.f32.mrb[9].mxu0 }
 0x49d   : > { %v996_v49 = vpop.f32.mrb[10].mxu0 }
 0x49e   : > { %v1921_v50 = vpop.f32.mrb[11].mxu0  ;;  %v1838_v49 = vld [vmem:[%s2961_s15] ss:$0 sm:$0xff] }
 0x50e   : > { %v1106_v52 = vpop.f32.mrb[12].mxu0 }
 0x50f   : > { %1333 = vrot.lane.b32.xlu1 %v1106_v52, %s2425_s26  ;;  %v1932_v53 = vpop.f32.mrb[13].mxu0  ;;  %s3017_s26 = sld [smem:[#allocation36_spill]] }
 0x510   : > { %v1109_v54 = vpop.f32.mrb[14].mxu0 }
 0x511   : > { %v1933_v55 = vpop.f32.mrb[15].mxu0 }
 0x517   : > { %v1216_v57 = vpop.f32.mrb[16].mxu0 }
 0x518   : > { %1337 = vrot.lane.b32.xlu0 %v1216_v57, %s2426_s20  ;;  %v1944_v58 = vpop.f32.mrb[17].mxu0  ;;  %s2898_s20 = scalar_lea.hbm %s3017_s26, %s1847_s18 }
 0x519   : > { %v1219_v59 = vpop.f32.mrb[18].mxu0 }
 0x51a   : > { %v1945_v60 = vpop.f32.mrb[19].mxu0 }
 0x51f   : > { %v1326_v61 = vpop.f32.mrb[20].mxu0 }
 0x520   : > { %1341 = vrot.lane.b32.xlu1 %v1326_v61, %s2427_s19  ;;  %v1956_v62 = vpop.f32.mrb[21].mxu0  ;;  %s1635_s19 = scalar_lea.sflag [#allocation4], %s669_s5 }
 0x521   : > { %v1329_v63 = vpop.f32.mrb[22].mxu0 }
 0x522   : > { %v1957_v1 = vpop.f32.mrb[23].mxu0 }
 0x581   : > { %v1334_v2 = vpop.permute.xlu1 %1333 }
 0x582   : > { %v1344_v4 = vsel %vm893_vm2, %v993_v47, %v1334_v2 }
 0x58a   : > { %v1338_v3 = vpop.permute.xlu0 %1337 }
 0x58b   : > { %v1346_v6 = vsel %vm1345_vm4, %v1344_v4, %v1338_v3  ;;  %v1844_v3 = vld [vmem:[%s3015_s25] ss:$0 sm:$0xff] }
 0x592   : > { %v1342_v7 = vpop.permute.xlu1 %1341 }
 0x593   : > { %v1348_v8 = vsel %vm1347_vm5, %v1346_v6, %v1342_v7  ;;  %v1845_v6 = vld [vmem:[%s3016_s17] ss:$0 sm:$0xff] }
 0x594   : > { %v1349_v9 = vpack.c.bf16 %v1348_v8, %v1348_v8 }
 0x596   : > { %1963 = vmatmul.mubr.msk.bf16.vlgmr.msra.gmra.mrb[20].mxu1 %vm709_vm1, %v1349_v9 }
 0x597   : > { %1982 = vmatprep.mubr.msk.bf16.mxu1 %vm2421_vm0, %v2420_v0  ;;  %1975 = vmatpush3.bf16.msra.mxu1 %v2122_v34 }
 0x598   : > { %1976 = vmatprep.subr.bf16.mxu1 %v2420_v0 }
 0x59b   : > { %1977 = vmatpush3.bf16.msra.mxu1 %v2123_v35 }
 0x59c   : > { %1978 = vmatprep.subr.bf16.mxu1 %v2420_v0 }
 0x59f   : > { %1979 = vmatpush3.bf16.msra.mxu1 %v2124_v36 }
 0x5a0   : > { %1980 = vmatprep.subr.bf16.mxu1 %v2420_v0 }
 0x5a3   : > { %1981 = vmatpush3.bf16.msra.mxu1 %v2125_v37 }
 0x669   : > { %v1410_v11 = vpop.f32.mrb[20].mxu1 }
 0x66a   : > { %v1411_v12 = vadd.f32 %v1828_v10, %v1410_v11  ;;  %v1964_v13 = vpop.f32.mrb[21].mxu1 }
 0x66b   : > { %v1413_v14 = vpop.f32.mrb[22].mxu1 }
 0x66c   : > { %v1965_v15 = vpop.f32.mrb[23].mxu1  ;;  %v1416_v16 = vadd.f32 %v1411_v12, %v2763_v5 }
 0x66e   : > { %v1419_v17 = vsel %vm709_vm1, %v1416_v16, 0.0 }
 0x66f   : > { %1420 = vadd.xlane.f32.xlu0 %v1419_v17 }
 0x6fc   : > { %v1421_v18 = vpop.xlane.xlu0 %1420 }
 0x6fd   : > { %v1423_v19 = vmul.f32 0.03125, %v1421_v18 }
 0x6ff   : > { %v1424_v20 = vsub.f32 %v1416_v16, %v1423_v19 }
 0x701   : > { %v1425_v21 = vmul.f32 %v1424_v20, %v1424_v20 }
 0x703   : > { %v1426_v22 = vsel %vm709_vm1, %v1425_v21, 0.0 }
 0x704   : > { %1427 = vadd.xlane.f32.xlu1 %v1426_v22 }
 0x791   : > { %v1428_v5 = vpop.xlane.xlu1 %1427 }
 0x792   : > { %v1429_v25 = vmul.f32 0.03125, %v1428_v5 }
 0x794   : > { %v1430_v26 = vadd.f32 1e-12, %v1429_v25 }
 0x796   : > { %2142 = vrsqrt.f32 %v1430_v26 }
 0x7a0   : > { %v2143_v27 = vpop.eup %2142 }
 0x7a1   : > { %v1432_v29 = vmul.f32 %v2143_v27, %v1424_v20 }
 0x7a3   : > { %v1439_v31 = vmul.f32 %v1832_v28, %v1432_v29 }
 0x7a5   : > { %v1446_v32 = vadd.f32 %v1833_v30, %v1439_v31 }
 0x7a7   : > { %v1447_v33 = vpack.c.bf16 %v1446_v32, %v1446_v32 }
 0x7a9   : > { %1971 = vmatmul.mubr.msk.bf16.vlgmr.msra.gmra.mrb[24].mxu0 %vm709_vm1, %v1447_v33 }
 0x87c   : > { %v1508_v39 = vpop.f32.mrb[24].mxu0 }
 0x87d   : > { %v1509_v40 = vadd.f32 %v1834_v38, %v1508_v39  ;;  %v1972_v41 = vpop.f32.mrb[25].mxu0 }
 0x87e   : > { %v1511_v42 = vpop.f32.mrb[26].mxu0 }
 0x87f   : > { %v1515_v43 = vmul.f32 0.70710677, %v1509_v40  ;;  %v1973_v44 = vpop.f32.mrb[27].mxu0  ;;  %v1514_v46 = vmul.f32 0.5, %v1509_v40 }
 0x881   : > { %2144 = verf.f32 %v1515_v43 }
 0x88b   : > { %v2145_v45 = vpop.eup %2144 }
 0x88c   : > { %v1517_v47 = vadd.f32 1.0, %v2145_v45 }
 0x88e   : > { %v1518_v0 = vmul.f32 %v1517_v47, %v1514_v46 }
 0x890   : > { %v1519_v48 = vpack.c.bf16 %v1518_v0, %v1518_v0 }
 0x892   : > { %1983 = vmatmul.mubr.msk.bf16.vlgmr.msra.gmra.mrb[24].mxu1 %vm1559_vm6, %v1519_v48 }
 0x965   : > { %v1597_v50 = vpop.f32.mrb[24].mxu1 }
 0x966   : > { %v1598_v51 = vadd.f32 %v1838_v49, %v1597_v50  ;;  %v1984_v52 = vpop.f32.mrb[25].mxu1 }
 0x967   : > { %v1600_v53 = vpop.f32.mrb[26].mxu1 }
 0x968   : > { %v1985_v54 = vpop.f32.mrb[27].mxu1  ;;  %v1603_v55 = vadd.f32 %v1598_v51, %v1446_v32 }
 0x96a   : > { %v1606_v56 = vsel %vm709_vm1, %v1603_v55, 0.0 }
 0x96b   : > { %1607 = vadd.xlane.f32.xlu0 %v1606_v56 }
 0x9f8   : > { %v1608_v57 = vpop.xlane.xlu0 %1607 }
 0x9f9   : > { %v1609_v58 = vmul.f32 0.03125, %v1608_v57 }
 0x9fb   : > { %v1610_v59 = vsub.f32 %v1603_v55, %v1609_v58 }
 0x9fd   : > { %v1611_v60 = vmul.f32 %v1610_v59, %v1610_v59 }
 0x9ff   : > { %v1612_v61 = vsel %vm709_vm1, %v1611_v60, 0.0 }
 0xa00   : > { %1613 = vadd.xlane.f32.xlu0 %v1612_v61 }
 0xa8d   : > { %v1614_v62 = vpop.xlane.xlu0 %1613 }
 0xa8e   : > { %v1615_v63 = vmul.f32 0.03125, %v1614_v62 }
 0xa90   : > { %v1616_v1 = vadd.f32 1e-12, %v1615_v63 }
 0xa92   : > { %2146 = vrsqrt.f32 %v1616_v1 }
 0xa9c   : > { %v2147_v2 = vpop.eup %2146 }
 0xa9d   : > { %v1618_v4 = vmul.f32 %v2147_v2, %v1610_v59 }
 0xa9f   : > { %v1625_v7 = vmul.f32 %v1844_v3, %v1618_v4 }
 0xaa1   : > { %v1632_v8 = vadd.f32 %v1845_v6, %v1625_v7 }
 0xaa3   : > { %1633 = vst.msk [vmem:[%s671_s24] sm:$0xff] %vm709_vm1, %v1632_v8 }
 0xaa4   : > { %2329 = shalt.err (!%p2326_p6)
}
 0xaa5   : > { %s2330_s5 = scalar_lea.hbm %s2898_s20, 128  ;;  %s2334_s25 = scalar_lea.hbm %s3017_s26, 256 }
 0xaa6   : > { %p2331_p7 = scmp.ne.s32.totalorder %s2898_s20, %s2330_s5  ;;  %p2335_p0 = scmp.lt.u32.totalorder %s2898_s20, %s3017_s26 }
 0xaa7   : > { %p2336_p2 = scmp.lt.u32.totalorder %s2334_s25, %s2330_s5  ;;  %p2338_p1 = scmp.lt.u32.totalorder %s2330_s5, %s2898_s20 }
 0xaa8   : > { %p2332_p9 = pnand %p2331_p7, %p3018_p4 }
 0xaa9   : > { %p2337_p13 = por %p2336_p2, %p2335_p0 }
 0xaaa   : > { %p2333_p12 = pneg %p2332_p9 }
 0xaab   : > { %p2339_p8 = por %p2338_p1, %p2337_p13 }
 0xaad   : > { %p2340_p10 = pnand %p2339_p8, %p2333_p12 }
 0xaaf   : > { %2343 = shalt.err (!%p2340_p10)
}
 0xab0   : > { %2010 = dma.vmem_to_hbm [thread:$0]  (%p3018_p4), %s2900_s29, 128, %s2898_s20, %s1635_s19  }
 0xab1 PF: > { %s3019_s17 = sld [smem:[#allocation23_spill]]  ;;  %s3020_s18 = sld [smem:[#allocation19_spill]] }
 0xab2   : > { %s3021_s24 = sld [smem:[#allocation26_spill]] }
 0xab7   : > { %p2047_p11 = scmp.ge.s32.totalorder %s3019_s17, 2  ;;  %s1661_s27 = sand.u32 1, %s3020_s18  }
 0xab8   : > { %p3022_p3 = scmp.ne.s32.totalorder %s3021_s24, 0  ;;  %s1662_s22 = scalar_lea.sflag [#allocation4], %s1661_s27 }
 0xaba   : > { %p2032_p5 = pnand %p2047_p11, %p3022_p3 }
 0xabc   : > { %2385 = dma.done.wait (!%p2032_p5), %s1662_s22, 128  }
 0xabd   : > { %2387 = vsyncadd (!%p2032_p5), %s1662_s22, 4294967168  ;;  %s35_s19 = sadd.s32 1, %s3019_s17   ;;  %s3023_s27 = sld [smem:[#allocation20_spill]] }
 0xabe   : > { %p32_p6 = scmp.ge.s32.totalorder %s35_s19, 4   ;;  %s3024_s28 = sld [smem:[#allocation21_spill]] }
 0xabf   : > { %s3025_s29 = sld [smem:[#allocation27_spill]]  ;;  %s3026_s30 = sld [smem:[#allocation22_spill]] }
 0xac0   : > { %s3027_s0 = sld [smem:[#allocation24_spill]]  ;;  %34 = sbr.rel (!%p32_p6) target bundleno = 18 (0x12), region = 156 }
 0xac7   :  { %1667 = vsyncpa [#allocation3], 1 }
 0xac8   :  { %1669 = vsyncpa [#allocation3 + $0x1], 1 }
 0xac9   :  { %1670 = vsyncpa [#allocation6], 1 }
 0xaca   :  { %1671 = vsyncpa [#allocation9], 1 }
 0xacb   :  { %1672 = vsyncpa [#allocation12], 1 }
 0xacc   :  { %1673 = vsyncpa [#allocation4], 1 }
 0xacd   :  { %1675 = vsyncpa [#allocation4 + $0x1], 1 }

</bundles_post_ra>
